<compile_context>
chip_gen: v7x
topology: tpu7x:2x2x1
jax: 0.10.0
libtpu: 0.0.40
codegen_flags: <defaults>
</compile_context>

<pallas_src>
import math

import jax
import jax.numpy as jnp
import numpy as np
from jax import lax
from jax.experimental import pallas as pl
from jax.experimental.pallas import tpu as pltpu


# ----------------------------- kernel ---------------------------------------


def pos_enc_kernel(taps_ref, w_ref, posb_ref, out_ref):
    """Fused Conv1d(in=1, out=E, k=3, pad=1) + clf-token slot + positional add.

    taps_ref : (b_tile, t_tile, 3)  pre-shifted conv taps; time row 0 is the clf
                                    slot (all three taps are zero there).
    w_ref    : (3, E)               conv weight, (kernel_tap, out_channel).
    posb_ref : (t_tile, E)          positional table, conv bias folded into rows 1..L.
    out_ref  : (b_tile, t_tile, E)
    """
    bt, tt, k = taps_ref.shape
    e = out_ref.shape[-1]
    # Layout-trivial collapse (t_tile is a multiple of 8), then one small MXU matmul
    # whose result is already lane-dense on E (no tap relayout / lane broadcasts).
    taps2d = taps_ref[...].reshape(bt * tt, k)                       # (rows, 3)
    conv = jnp.dot(taps2d, w_ref[...],
                   precision=lax.Precision.HIGHEST,
                   preferred_element_type=jnp.float32)               # (rows, E)
    out_ref[...] = (conv.reshape(bt, tt, e)
                    + posb_ref[...][None, :, :]).astype(out_ref.dtype)


# ------------------------- tiling / VMEM sizing ------------------------------


def _round_up(x, m):
    return (x + m - 1) // m * m


def _vmem_budget_and_limit():
    """Generation-aware VMEM sizing (v5e/v6e: 128 MiB physical, v7x: 64 MiB)."""
    try:
        phys = int(pltpu.get_tpu_info().vmem_capacity_bytes)
    except Exception:
        phys = 64 << 20                       # conservative: v7x per-core VMEM
    budget = min(phys // 3, 24 << 20)         # double-buffered working-set target
    limit = min(phys * 3 // 4, 64 << 20)      # scoped-VMEM limit handed to Mosaic
    return budget, limit


def _choose_tiles(B, Lk, E, budget_bytes):
    """Pick (b_tile, t_tile) for the (batch, time) grid.

    Per (b, t) output row the double-buffered footprint is roughly
      4 * (2*E_pad [out] + E_pad [f32 matmul temp] + 2*128 [taps: k=3 lane-pads to 128])
    plus the time-indexed posb block (2x) and the resident weight block.
    """
    e_pad = _round_up(E, 128)
    per_row = 4 * (3 * e_pad + 2 * 128)
    fixed = lambda tt: 4 * (2 * tt * e_pad + 8 * e_pad)   # 2x posb + resident weight

    # Largest time tile (multiple of 8, <= Lk) whose b_tile=1 footprint fits.
    t_tile = max(8, (Lk // 8) * 8)
    while t_tile > 8 and per_row * t_tile + fixed(t_tile) > budget_bytes:
        t_tile = max(8, ((t_tile // 2) // 8) * 8)

    # Grow the batch tile within the remaining budget.
    b_tile = int(max(1, min(B, (budget_bytes - fixed(t_tile)) // (per_row * t_tile))))

    # v7x megacore: prefer >= 2 grid steps so both TensorCores get work.
    if B > 1 and -(-B // b_tile) * -(-Lk // t_tile) < 2:
        b_tile = (B + 1) // 2
    return b_tile, t_tile


# ------------------------------ wrapper --------------------------------------


def positional_encoding_forward(x, w_oik, bias, pos_emb, *, out_dtype=jnp.float32):
    """x: (B, L) f32; w_oik: (E, 1, 3) torch Conv1d layout; bias: (E,); pos_emb: (L+1, E)."""
    B, L = x.shape
    E = bias.shape[0]
    Lp = L + 1
    assert pos_emb.shape == (Lp, E), pos_emb.shape

    # ---- trace-time glue (x is ~E-times smaller than the output) ----
    x = x.astype(jnp.float32)
    x00 = jnp.pad(x, ((0, 0), (1, 0)))                  # tap w[:,1]: x[r-1]
    xm1 = jnp.pad(x, ((0, 0), (2, 0)))[:, :Lp]          # tap w[:,0]: x[r-2]
    xp1 = jnp.pad(x[:, 1:], ((0, 0), (1, 1)))           # tap w[:,2]: x[r]
    taps = jnp.stack([xm1, x00, xp1], axis=-1)          # (B, Lp, 3); row 0 = clf = zeros

    w_ke = jnp.transpose(w_oik[:, 0, :]).astype(jnp.float32)        # (3, E)
    posb = (pos_emb.astype(jnp.float32)
            .at[1:].add(bias.astype(jnp.float32)[None, :]))         # bias in rows 1..L

    # Degenerate tiny sequences (L < 7): keep the in-kernel 2-D collapse 8-aligned.
    pad_t = (8 - Lp) if Lp < 8 else 0
    if pad_t:
        taps = jnp.pad(taps, ((0, 0), (0, pad_t), (0, 0)))
        posb = jnp.pad(posb, ((0, pad_t), (0, 0)))
    Lk = Lp + pad_t                                      # kernel-visible time extent

    budget, vmem_limit = _vmem_budget_and_limit()
    b_tile, t_tile = _choose_tiles(B, Lk, E, budget)
    grid = (pl.cdiv(B, b_tile), pl.cdiv(Lk, t_tile))     # edge blocks overhang -> masked

    out = pl.pallas_call(
        pos_enc_kernel,
        out_shape=jax.ShapeDtypeStruct((B, Lk, E), out_dtype),
        grid=grid,
        in_specs=[
            pl.BlockSpec((b_tile, t_tile, 3), lambda i, t: (i, t, 0)),   # taps
            pl.BlockSpec((3, E), lambda i, t: (0, 0)),                   # weight (resident)
            pl.BlockSpec((t_tile, E), lambda i, t: (t, 0)),              # pos(+bias)
        ],
        out_specs=pl.BlockSpec((b_tile, t_tile, E), lambda i, t: (i, t, 0)),
        compiler_params=pltpu.CompilerParams(
            dimension_semantics=("parallel", "parallel"),
            vmem_limit_bytes=vmem_limit),
    )(taps, w_ke, posb)

    return out[:, :Lp, :] if pad_t else out


# -------------------------- reference & helpers ------------------------------


def make_positional_embedding(seq_length, embedding_size):
    positions = jnp.arange(0.0, seq_length, dtype=jnp.float32)[:, None]
    div = jnp.exp(jnp.arange(0.0, embedding_size, 2.0, dtype=jnp.float32)
                  * -(math.log(10000.0) / embedding_size))
    pe = jnp.zeros((seq_length, embedding_size), jnp.float32)
    pe = pe.at[:, 0::2].set(jnp.sin(positions * div))
    pe = pe.at[:, 1::2].set(jnp.cos(positions * div))
    token_position = jnp.zeros((1, embedding_size), jnp.float32)
    return jnp.concatenate([token_position, pe], axis=0)    # (L+1, E)


def reference_forward(x, w_oik, bias, pos_emb):
    """Pure-JAX reference matching the PyTorch forward (eval mode)."""
    xin = x[:, None, :].astype(jnp.float32)                  # (B, 1, L) NCW
    conv = lax.conv_general_dilated(
        xin, w_oik, window_strides=(1,), padding=((1, 1),),
        dimension_numbers=("NCH", "OIH", "NCH"),
        precision=lax.Precision.HIGHEST)
    conv = conv + bias[None, :, None]
    conv = jnp.transpose(conv, (0, 2, 1))                    # (B, L, E)
    B = x.shape[0]
    E = bias.shape[0]
    clf = jnp.zeros((B, 1, E), jnp.float32)
    return jnp.concatenate([clf, conv], axis=1) + pos_emb[None, :, :]


# --------------------------------- main --------------------------------------


if __name__ == "__main__":
    key = jax.random.PRNGKey(0)

    def run_case(B, L, E):
        kw, kb, kx = jax.random.split(jax.random.fold_in(key, B * 1000 + L * 10 + E), 3)
        bound = 1.0 / math.sqrt(1 * 3)            # PyTorch Conv1d init bound (fan_in = 3)
        w_oik = jax.random.uniform(kw, (E, 1, 3), jnp.float32, minval=-bound, maxval=bound)
        bias = jax.random.uniform(kb, (E,), jnp.float32, minval=-bound, maxval=bound)
        pos_emb = make_positional_embedding(L, E)            # (L+1, E)
        x = jax.random.normal(kx, (B, L), jnp.float32)

        out = jax.block_until_ready(positional_encoding_forward(x, w_oik, bias, pos_emb))
        ref = jax.block_until_ready(reference_forward(x, w_oik, bias, pos_emb))
        assert out.shape == (B, L + 1, E), out.shape
        np.testing.assert_allclose(np.asarray(out), np.asarray(ref), rtol=1e-5, atol=1e-5)

    # Lane-dense embedding (E multiple of 128); exercises the time-overhang edge block.
    run_case(B=16, L=16, E=128)
    # Module defaults (seq_length=20, embedding_size=72): E < 128 -> masked stores.
    run_case(B=4, L=20, E=72)
    # Small case with a second time block and tiny batch.
    run_case(B=2, L=8, E=32)

    print("KERNEL_OK")
</pallas_src>

<mosaic_0001>
module attributes {stable_mosaic.version = 11 : i64} {
  func.func @pos_enc_kernel(%arg0: i32, %arg1: i32, %arg2: memref<16x16x3xf32, #tpu.memory_space<vmem>>, %arg3: memref<3x128xf32, #tpu.memory_space<vmem>>, %arg4: memref<16x128xf32, #tpu.memory_space<vmem>>, %arg5: memref<16x16x128xf32, #tpu.memory_space<vmem>>) attributes {dimension_semantics = [#tpu.dimension_semantics<parallel>, #tpu.dimension_semantics<parallel>], iteration_bounds = array<i64: 1, 2>, scalar_prefetch = 0 : i64, scratch_operands = 0 : i64, tpu.core_type = #tpu.core_type<tc>, window_params = [{transform_indices = @transform_0, window_bounds = array<i64: 16, 16, 3>}, {pipeline_mode = #tpu.pipeline_mode<synchronous>, transform_indices = @transform_1, window_bounds = array<i64: 3, 128>}, {transform_indices = @transform_2, window_bounds = array<i64: 16, 128>}, {transform_indices = @transform_3, window_bounds = array<i64: 16, 16, 128>}]} {
    %c0 = arith.constant 0 : index
    %c0_0 = arith.constant 0 : index
    %c0_1 = arith.constant 0 : index
    %0 = vector.load %arg2[%c0, %c0_0, %c0_1] : memref<16x16x3xf32, #tpu.memory_space<vmem>>, vector<16x16x3xf32>
    %1 = vector.shape_cast %0 : vector<16x16x3xf32> to vector<256x3xf32>
    %c0_2 = arith.constant 0 : index
    %c0_3 = arith.constant 0 : index
    %2 = vector.load %arg3[%c0_2, %c0_3] : memref<3x128xf32, #tpu.memory_space<vmem>>, vector<3x128xf32>
    %cst = arith.constant dense<0.000000e+00> : vector<256x128xf32>
    %3 = tpu.matmul %1, %2, %cst {dimension_numbers = #tpu.dot_dimension_numbers<[1], [0], [0], [1], [0, 0, 1, 1], [], []>, precision = #tpu.contract_precision<fp32>} : vector<256x3xf32>, vector<3x128xf32>, vector<256x128xf32> -> vector<256x128xf32>
    %4 = vector.shape_cast %3 : vector<256x128xf32> to vector<16x16x128xf32>
    %c0_4 = arith.constant 0 : index
    %c0_5 = arith.constant 0 : index
    %5 = vector.load %arg4[%c0_4, %c0_5] : memref<16x128xf32, #tpu.memory_space<vmem>>, vector<16x128xf32>
    %6 = vector.shape_cast %5 : vector<16x128xf32> to vector<1x16x128xf32>
    %7 = vector.broadcast %6 : vector<1x16x128xf32> to vector<16x16x128xf32>
    %8 = arith.addf %4, %7 : vector<16x16x128xf32>
    %c0_6 = arith.constant 0 : index
    %c0_7 = arith.constant 0 : index
    %c0_8 = arith.constant 0 : index
    %9 = vector.load %arg5[%c0_6, %c0_7, %c0_8] : memref<16x16x128xf32, #tpu.memory_space<vmem>>, vector<16x16x128xf32>
    tpu.vector_store %arg5[%c0_6, %c0_7, %c0_8], %8 {strides = array<i32>} : memref<16x16x128xf32, #tpu.memory_space<vmem>>, vector<16x16x128xf32>,
    return
  }
  func.func @transform_0(%arg0: i32, %arg1: i32) -> (i32, i32, i32) {
    %c0_i32 = arith.constant 0 : i32
    %c0_i32_0 = arith.constant 0 : i32
    return %arg0, %arg1, %c0_i32 : i32, i32, i32
  }
  func.func @transform_1(%arg0: i32, %arg1: i32) -> (i32, i32) {
    %c0_i32 = arith.constant 0 : i32
    %c0_i32_0 = arith.constant 0 : i32
    %c0_i32_1 = arith.constant 0 : i32
    return %c0_i32, %c0_i32_0 : i32, i32
  }
  func.func @transform_2(%arg0: i32, %arg1: i32) -> (i32, i32) {
    %c0_i32 = arith.constant 0 : i32
    %c0_i32_0 = arith.constant 0 : i32
    return %arg1, %c0_i32 : i32, i32
  }
  func.func @transform_3(%arg0: i32, %arg1: i32) -> (i32, i32, i32) {
    %c0_i32 = arith.constant 0 : i32
    %c0_i32_0 = arith.constant 0 : i32
    return %arg0, %arg1, %c0_i32 : i32, i32, i32
  }
}

</mosaic_0001>

<bundles_post_ra>
// kernel: tpu_custom_call.1
= control target key start
LH: loop header
LB: loop body
LE: loop exit
PB: predicated region body
PF: predicated region fallthrough
CT: control target
= control target key end

     0   :  { %s4053_s12 = smov 0   ;;  %s4055_s13 = smov 0   ;;  %s5025_s0 = inlined_call_operand.vmem [shape: f32[16,17,3], index: 0, kind: input, shape index: {}]   ;;  %s5026_s1 = inlined_call_operand.vmem [shape: f32[3,128], index: 1, kind: input, shape index: {}]   ;;  %s5027_s2 = inlined_call_operand.vmem [shape: f32[17,128], index: 2, kind: input, shape index: {}]   ;;  %s5028_s3 = inlined_call_operand.vmem [shape: f32[16,17,128], index: 3, kind: output, shape index: {}]  }
   0x1   :  { %s4057_s14 = smov 0   ;;  %s4059_s15 = smov 0  }
   0x2   :  { %s4061_s16 = smov 0  }
   0x3 LB: > { %s22_s17 = sadd.s32 1, %s3963_s15  ;;  %s2992_s18 = sadd.s32 4294967295, %s3967_s16   ;;  %s3967_s16 = sphi %s4061_s16, %s13_s16   ;;  %s3963_s15 = sphi %s4059_s15, %s5103_s15   ;;  %s3959_s14 = sphi %s4057_s14, %s5102_s14   ;;  %s3955_s13 = sphi %s4055_s13, %s5101_s13   ;;  %s3951_s12 = sphi %s4053_s12, %s5100_s12  }
   0x4   : > { %p23_p0 = scmp.ge.s32.totalorder %s22_s17, 2  ;;  %p41_p1 = scmp.ne.s32.totalorder %s3955_s13, %s3951_s12 }
   0x5   : > { %p42_p2 = scmp.eq.s32.totalorder %s3967_s16, 0  ;;  %p120_p4 = scmp.eq.s32.totalorder %s2992_s18, 1 }
   0x6   : > { %s5105_s17 = smov (%p23_p0, %s22_s17), 0  ;;  %s34_s20 = sadd.s32 1, %s3955_s13 }
   0x7   : > { %p43_p3 = por %p42_p2, %p41_p1  ;;  %s30_s19 = ssub.s32 %s3963_s15, %s5105_s17 }
   0x8   : > { %p32_p5 = scmp.eq.s32.totalorder %s30_s19, 0  ;;  %p4088_p6 = por %p120_p4, %p41_p1 }
   0x9   : > { %p2995_p7 = scmp.ge.s32.totalorder %s3967_s16, 2 }
   0xa   : > { %s4093_s22 = scalar_select %p32_p5, %s3955_s13, %s34_s20  }
   0xb   : > { %145 = sbr.rel (%p2995_p7) target bundleno = 81 (0x51), region = 20 }
  0x12   : > { %148 = sbr.rel (!%p43_p3) target bundleno = 81 (0x51), region = 24  ;;  %s150_s23 = sand.u32 (%p43_p3), 1, %s3955_s13  }
  0x13   : > { %s2997_s24 = sshll.u32 (%p43_p3), %s3963_s15, 1  ;;  %s2996_s25 = sshll.u32 (%p43_p3), %s150_s23, 8 }
  0x14   : > { %s155_s26 = ssub.s32 (%p43_p3), 3, %s2997_s24  ;;  %s3033_s27 = sshll.u32 (%p43_p3), %s3963_s15, 4 }
  0x15   : > { %p156_p8 = scmp.lt.s32.totalorder (%p43_p3), %s155_s26, 2  ;;  %s4104_s30 = scalar_lea.vmem (%p43_p3), %s5025_s0, %s3033_s27  }
  0x16   : > { %s4107_s5 = scalar_lea.vmem (%p43_p3), [#allocation2], %s2996_s25  }
  0x19   : > { %s5107_s26 = smov (!%p156_p8, %s155_s26), 2 }
  0x1a   : > { %s2998_s4 = sshll.u32 %s5107_s26, 11 }
  0x1b   : > { %p3001_p9 = scmp.eq.s32.totalorder %s2998_s4, 0 }
  0x1c   : > { %s4110_s6 = sshrl.u32 (!%p3001_p9), %s5107_s26, 1 }
  0x1d   : > { %166 = sbr.rel (%p3001_p9) target bundleno = 81 (0x51), region = 28  ;;  %p3002_p10 = scmp.le.s32.totalorder (!%p3001_p9), %s4110_s6, 0 }
  0x24   : > { %2906 = sbr.rel (%p3002_p10) target bundleno = 60 (0x3c), region = 184  ;;  %s5048_s7 = smov (!%p3002_p10), %s4107_s5 }
  0x25   : > { %s5049_s8 = smov (!%p3002_p10), %s4104_s30  ;;  %s4119_s9 = smov (!%p3002_p10), 0  }
  0x26   : > { %s4121_s10 = smov (!%p3002_p10), 0  }
  0x2b LB: >> { %v320_v0 = vld [vmem:[%s3975_s8] sm:$0xff]  ;;  %v322_v1 = vld [vmem:[%s3975_s8 + $0x8] sm:$0xff]  ;;  %v324_v2 = vld [vmem:[%s3975_s8 + $0x18] sm:$0xff]  ;;  %s384_s11 = sadd.s32 1, %s3979_s9  ;;  %s314_s10 = sadd.s32 1, %s3983_s10   ;;  %s3983_s10 = sphi %s4121_s10, %s314_s10   ;;  %s3979_s9 = sphi %s4119_s9, %s5052_s9   ;;  %s3975_s8 = sphi %s5049_s8, %s5051_s8   ;;  %s3971_s7 = sphi %s5048_s7, %s5050_s7  }
  0x2c   : >> { %321 = vst [vmem:[%s3971_s7] sm:$0xff] %v320_v0  ;;  %323 = vst [vmem:[%s3971_s7 + $0x8] sm:$0xff] %v322_v1  ;;  %v326_v3 = vld [vmem:[%s3975_s8 + $0x20] sm:$0xff]  ;;  %v328_v4 = vld [vmem:[%s3975_s8 + $0x30] sm:$0xff]  ;;  %p385_p11 = scmp.ge.s32.totalorder %s384_s11, %s4110_s6  ;;  %p313_p12 = scmp.ge.s32.totalorder %s314_s10, %s4110_s6 }
  0x2d   : >> { %325 = vst [vmem:[%s3971_s7 + $0x10] sm:$0xff] %v324_v2  ;;  %v330_v5 = vld [vmem:[%s3975_s8 + $0x38] sm:$0xff]  ;;  %327 = vst [vmem:[%s3971_s7 + $0x18] sm:$0xff] %v326_v3  ;;  %v332_v6 = vld [vmem:[%s3975_s8 + $0x48] sm:$0xff] }
  0x2e   : >> { %329 = vst [vmem:[%s3971_s7 + $0x20] sm:$0xff] %v328_v4  ;;  %331 = vst [vmem:[%s3971_s7 + $0x28] sm:$0xff] %v330_v5  ;;  %v334_v7 = vld [vmem:[%s3975_s8 + $0x50] sm:$0xff]  ;;  %v336_v8 = vld [vmem:[%s3975_s8 + $0x60] sm:$0xff]  ;;  %s5109_s11 = smov (%p385_p11, %s384_s11), 0 }
  0x2f   : >> { %333 = vst [vmem:[%s3971_s7 + $0x30] sm:$0xff] %v332_v6  ;;  %335 = vst [vmem:[%s3971_s7 + $0x38] sm:$0xff] %v334_v7  ;;  %v338_v9 = vld [vmem:[%s3975_s8 + $0x68] sm:$0xff]  ;;  %v340_v10 = vld [vmem:[%s3975_s8 + $0x78] sm:$0xff]  ;;  %s3003_s18 = sshll.u32 %s5109_s11, 4  ;;  %s5052_s9 = smov %s5109_s11 }
  0x30   : >> { %337 = vst [vmem:[%s3971_s7 + $0x40] sm:$0xff] %v336_v8  ;;  %v342_v11 = vld [vmem:[%s3975_s8 + $0x80] sm:$0xff]  ;;  %339 = vst [vmem:[%s3971_s7 + $0x48] sm:$0xff] %v338_v9  ;;  %v344_v12 = vld [vmem:[%s3975_s8 + $0x90] sm:$0xff]  ;;  %s4177_s19 = scalar_lea.vmem %s4104_s30, %s3003_s18   ;;  %s390_s20 = scalar_lea.vmem %s4107_s5, %s3003_s18 [#allocation2]  }
  0x31   : >> { %341 = vst [vmem:[%s3971_s7 + $0x50] sm:$0xff] %v340_v10  ;;  %343 = vst [vmem:[%s3971_s7 + $0x58] sm:$0xff] %v342_v11  ;;  %v346_v13 = vld [vmem:[%s3975_s8 + $0x98] sm:$0xff]  ;;  %v348_v14 = vld [vmem:[%s3975_s8 + $0xa8] sm:$0xff] }
  0x32   : >> { %345 = vst [vmem:[%s3971_s7 + $0x60] sm:$0xff] %v344_v12  ;;  %347 = vst [vmem:[%s3971_s7 + $0x68] sm:$0xff] %v346_v13  ;;  %v350_v15 = vld [vmem:[%s3975_s8 + $0xb0] sm:$0xff]  ;;  %v352_v16 = vld [vmem:[%s3975_s8 + $0xc0] sm:$0xff] }
  0x33   : >> { %349 = vst [vmem:[%s3971_s7 + $0x70] sm:$0xff] %v348_v14  ;;  %v354_v17 = vld [vmem:[%s3975_s8 + $0xc8] sm:$0xff]  ;;  %351 = vst [vmem:[%s3971_s7 + $0x78] sm:$0xff] %v350_v15  ;;  %v356_v18 = vld [vmem:[%s3975_s8 + $0xd8] sm:$0xff] }
  0x34   : >> { %353 = vst [vmem:[%s3971_s7 + $0x80] sm:$0xff] %v352_v16  ;;  %355 = vst [vmem:[%s3971_s7 + $0x88] sm:$0xff] %v354_v17  ;;  %v358_v19 = vld [vmem:[%s3975_s8 + $0xe0] sm:$0xff]  ;;  %v360_v20 = vld [vmem:[%s3975_s8 + $0xf0] sm:$0xff] }
  0x35   : >> { %357 = vst [vmem:[%s3971_s7 + $0x90] sm:$0xff] %v356_v18  ;;  %359 = vst [vmem:[%s3971_s7 + $0x98] sm:$0xff] %v358_v19  ;;  %v362_v21 = vld [vmem:[%s3975_s8 + $0xf8] sm:$0xff]  ;;  %v364_v22 = vld [vmem:[%s3975_s8 + $0x108] sm:$0xff]  ;;  %316 = sbr.rel (!%p313_p12) target bundleno = 43 (0x2b), region = 190 }
  0x36   : >> { %361 = vst [vmem:[%s3971_s7 + $0xa0] sm:$0xff] %v360_v20  ;;  %v366_v23 = vld [vmem:[%s3975_s8 + $0x110] sm:$0xff]  ;;  %363 = vst [vmem:[%s3971_s7 + $0xa8] sm:$0xff] %v362_v21  ;;  %v368_v24 = vld [vmem:[%s3975_s8 + $0x120] sm:$0xff] }
  0x37   : >> { %365 = vst [vmem:[%s3971_s7 + $0xb0] sm:$0xff] %v364_v22  ;;  %367 = vst [vmem:[%s3971_s7 + $0xb8] sm:$0xff] %v366_v23  ;;  %v370_v25 = vld [vmem:[%s3975_s8 + $0x128] sm:$0xff]  ;;  %v372_v26 = vld [vmem:[%s3975_s8 + $0x138] sm:$0xff] }
  0x38   : >> { %369 = vst [vmem:[%s3971_s7 + $0xc0] sm:$0xff] %v368_v24  ;;  %371 = vst [vmem:[%s3971_s7 + $0xc8] sm:$0xff] %v370_v25  ;;  %v374_v27 = vld [vmem:[%s3975_s8 + $0x140] sm:$0xff]  ;;  %v376_v28 = vld [vmem:[%s3975_s8 + $0x150] sm:$0xff] }
  0x39   : >> { %373 = vst [vmem:[%s3971_s7 + $0xd0] sm:$0xff] %v372_v26  ;;  %v378_v29 = vld [vmem:[%s3975_s8 + $0x158] sm:$0xff]  ;;  %375 = vst [vmem:[%s3971_s7 + $0xd8] sm:$0xff] %v374_v27  ;;  %v380_v30 = vld [vmem:[%s3975_s8 + $0x168] sm:$0xff] }
  0x3a   : >> { %377 = vst [vmem:[%s3971_s7 + $0xe0] sm:$0xff] %v376_v28  ;;  %379 = vst [vmem:[%s3971_s7 + $0xe8] sm:$0xff] %v378_v29  ;;  %v382_v31 = vld [vmem:[%s3975_s8 + $0x170] sm:$0xff]  ;;  %s5051_s8 = smov %s4177_s19 }
  0x3b   : >> { %381 = vst [vmem:[%s3971_s7 + $0xf0] sm:$0xff] %v380_v30  ;;  %383 = vst [vmem:[%s3971_s7 + $0xf8] sm:$0xff] %v382_v31  ;;  %s5050_s7 = smov %s390_s20 }
  0x3c PF: > { %s4218_s23 = sand.u32 1, %s5107_s26   ;;  %s3034_s24 = sshll.u32 %s4110_s6, 4 }
  0x3d   : > { %s4222_s25 = scalar_lea.vmem %s4104_s30, %s3034_s24   ;;  %s4225_s27 = scalar_lea.vmem %s4107_s5, %s3034_s24 [#allocation2]  }
  0x3e   : > { %p3008_p13 = scmp.le.s32.totalorder %s4218_s23, 0 }
  0x3f   : > { %s5053_s28 = smov (!%p3008_p13), %s4225_s27  ;;  %s5054_s29 = smov (!%p3008_p13), %s4222_s25 }
  0x40   : > { %2920 = sbr.rel (%p3008_p13) target bundleno = 81 (0x51), region = 195  ;;  %s4234_s4 = smov (!%p3008_p13), 0  }
  0x41   : > { %s4236_s7 = smov (!%p3008_p13), 0  }
  0x47 LB: >> { %v407_v32 = vld [vmem:[%s3991_s29] sm:$0xff]  ;;  %v409_v33 = vld [vmem:[%s3991_s29 + $0x18] sm:$0xff]  ;;  %v411_v34 = vld [vmem:[%s3991_s29 + $0x30] sm:$0xff]  ;;  %s439_s26 = sadd.s32 1, %s3995_s4  ;;  %s401_s7 = sadd.s32 1, %s3999_s7   ;;  %s3999_s7 = sphi %s4236_s7, %s401_s7   ;;  %s3995_s4 = sphi %s4234_s4, %s5055_s4   ;;  %s3991_s29 = sphi %s5054_s29, %s444_s29   ;;  %s3987_s28 = sphi %s5053_s28, %s445_s28  }
  0x48   : >> { %408 = vst [vmem:[%s3987_s28] sm:$0xff] %v407_v32  ;;  %410 = vst [vmem:[%s3987_s28 + $0x10] sm:$0xff] %v409_v33  ;;  %v413_v35 = vld [vmem:[%s3991_s29 + $0x48] sm:$0xff]  ;;  %v415_v36 = vld [vmem:[%s3991_s29 + $0x60] sm:$0xff]  ;;  %p440_p0 = scmp.ge.s32.totalorder %s439_s26, %s4218_s23  ;;  %p400_p1 = scmp.ge.s32.totalorder %s401_s7, %s4218_s23 }
  0x49   : >> { %412 = vst [vmem:[%s3987_s28 + $0x20] sm:$0xff] %v411_v34  ;;  %v417_v37 = vld [vmem:[%s3991_s29 + $0x78] sm:$0xff]  ;;  %414 = vst [vmem:[%s3987_s28 + $0x30] sm:$0xff] %v413_v35  ;;  %v419_v38 = vld [vmem:[%s3991_s29 + $0x90] sm:$0xff] }
  0x4a   : >> { %416 = vst [vmem:[%s3987_s28 + $0x40] sm:$0xff] %v415_v36  ;;  %418 = vst [vmem:[%s3987_s28 + $0x50] sm:$0xff] %v417_v37  ;;  %v421_v39 = vld [vmem:[%s3991_s29 + $0xa8] sm:$0xff]  ;;  %v423_v40 = vld [vmem:[%s3991_s29 + $0xc0] sm:$0xff]  ;;  %s5111_s26 = smov (%p440_p0, %s439_s26), 0  ;;  %403 = sbr.rel (!%p400_p1) target bundleno = 71 (0x47), region = 201 }
  0x4b   : >> { %420 = vst [vmem:[%s3987_s28 + $0x60] sm:$0xff] %v419_v38  ;;  %422 = vst [vmem:[%s3987_s28 + $0x70] sm:$0xff] %v421_v39  ;;  %v425_v41 = vld [vmem:[%s3991_s29 + $0xd8] sm:$0xff]  ;;  %v427_v42 = vld [vmem:[%s3991_s29 + $0xf0] sm:$0xff]  ;;  %s3009_s30 = sshll.u32 %s5111_s26, 3  ;;  %s5055_s4 = smov %s5111_s26 }
  0x4c   : >> { %424 = vst [vmem:[%s3987_s28 + $0x80] sm:$0xff] %v423_v40  ;;  %v429_v43 = vld [vmem:[%s3991_s29 + $0x108] sm:$0xff]  ;;  %426 = vst [vmem:[%s3987_s28 + $0x90] sm:$0xff] %v425_v41  ;;  %v431_v44 = vld [vmem:[%s3991_s29 + $0x120] sm:$0xff] }
  0x4d   : >> { %428 = vst [vmem:[%s3987_s28 + $0xa0] sm:$0xff] %v427_v42  ;;  %430 = vst [vmem:[%s3987_s28 + $0xb0] sm:$0xff] %v429_v43  ;;  %v433_v45 = vld [vmem:[%s3991_s29 + $0x138] sm:$0xff]  ;;  %v435_v46 = vld [vmem:[%s3991_s29 + $0x150] sm:$0xff] }
  0x4e   : >> { %432 = vst [vmem:[%s3987_s28 + $0xc0] sm:$0xff] %v431_v44  ;;  %434 = vst [vmem:[%s3987_s28 + $0xd0] sm:$0xff] %v433_v45  ;;  %v437_v47 = vld [vmem:[%s3991_s29 + $0x168] sm:$0xff]  ;;  %s444_s29 = scalar_lea.vmem %s4222_s25, %s3009_s30  }
  0x4f   : >> { %436 = vst [vmem:[%s3987_s28 + $0xe0] sm:$0xff] %v435_v46  ;;  %438 = vst [vmem:[%s3987_s28 + $0xf0] sm:$0xff] %v437_v47  ;;  %s445_s28 = scalar_lea.vmem %s4225_s27, %s3009_s30 [#allocation2]  }
  0x51 PF: > { %p3011_p2 = scmp.ge.s32.totalorder %s3967_s16, 1  ;;  %p467_p3 = scmp.lt.s32.totalorder %s3967_s16, 3 }
  0x53   : > { %p468_p4 = pnand %p3011_p2, %p467_p3 }
  0x55   : > { %471 = sbr.rel (%p468_p4) target bundleno = 570 (0x23a), region = 80 }
  0x5c   : > { %v563_v48 = vld [vmem:[%s5026_s1] sm:$0x7]  ;;  %vm661_vm0 = vcmask 1042432   ;;  %s474_s8 = sand.u32 1, %s3951_s12   ;;  %vm564_vm1 = vcmask 23552   ;;  %s4736_s12 = sshll.u32 %s3959_s14, 1 }
  0x5d   : > { %v663_v49 = vsel %vm661_vm0, %v563_v48, 0  ;;  %s4299_s9 = sshll.u32 %s474_s8, 8  ;;  %p516_p5 = scmp.lt.s32.totalorder %s4736_s12, 2 }
  0x5e   : > { %v4301_v50 = vand.u32 4294901760, %v663_v49  ;;  %s4304_s10 = scalar_lea.vmem [#allocation2], %s4299_s9  ;;  %s4750_s24 = scalar_lea.vmem [#allocation3], %s4299_s9  }
  0x5f   : > { %v531_v51 = vld [vmem:[%s4304_s10] sm:$0xff]  ;;  %v532_v52 = vld [vmem:[%s4304_s10 + $0x8] sm:$0xff]  ;;  %v533_v53 = vld [vmem:[%s4304_s10 + $0x10] sm:$0xff]  ;;  %s517_s11 = scalar_select %p516_p5, %s4736_s12, 2 }
  0x60   : > { %3387 = vmatprep.subr.mxu0 %v4301_v50  ;;  %v566_v54 = vsel %vm564_vm1, %v531_v51, 0  ;;  %v569_v55 = vsel %vm564_vm1, %v532_v52, 0  ;;  %3237 = vmatprep.subr.mxu1 %v4301_v50  ;;  %v4314_v56 = vsub.f32 %v663_v49, %v4301_v50  ;;  %v572_v57 = vsel %vm564_vm1, %v533_v53, 0  ;;  %v534_v58 = vld [vmem:[%s4304_s10 + $0x18] sm:$0xff]  ;;  %v535_v59 = vld [vmem:[%s4304_s10 + $0x20] sm:$0xff]  ;;  %v536_v60 = vld [vmem:[%s4304_s10 + $0x28] sm:$0xff] }
  0x61   : > { %3388 = vmatpush3.msra.mxu0 %v4301_v50  ;;  %v4321_v61 = vand.u32 4294901760, %v566_v54  ;;  %v4323_v62 = vand.u32 4294901760, %v569_v55  ;;  %3238 = vmatpush3.msra.mxu1 %v4301_v50  ;;  %v4326_v63 = vand.u32 4294901760, %v572_v57  ;;  %v575_v0 = vsel %vm564_vm1, %v534_v58, 0  ;;  %v537_v1 = vld [vmem:[%s4304_s10 + $0x30] sm:$0xff]  ;;  %v538_v18 = vld [vmem:[%s4304_s10 + $0x38] sm:$0xff] }
  0x62   : > { %v1054_v2 = vand.u32 4294901760, %v4314_v56  ;;  %v4331_v3 = vand.u32 4294901760, %v575_v0  ;;  %v578_v4 = vsel %vm564_vm1, %v535_v59, 0  ;;  %v581_v5 = vsel %vm564_vm1, %v536_v60, 0  ;;  %v539_v31 = vld [vmem:[%s4304_s10 + $0x40] sm:$0xff]  ;;  %v540_v32 = vld [vmem:[%s4304_s10 + $0x48] sm:$0xff] }
  0x63   : > { %v4336_v6 = vsub.f32 %v566_v54, %v4321_v61  ;;  %v4339_v7 = vsub.f32 %v569_v55, %v4323_v62  ;;  %v4342_v8 = vsub.f32 %v572_v57, %v4326_v63  ;;  %v4344_v9 = vand.u32 4294901760, %v578_v4  ;;  %v541_v33 = vld [vmem:[%s4304_s10 + $0x50] sm:$0xff]  ;;  %v542_v42 = vld [vmem:[%s4304_s10 + $0x58] sm:$0xff]  ;;  %v543_v43 = vld [vmem:[%s4304_s10 + $0x60] sm:$0xff]  ;;  %s3015_s18 = sshll.u32 %s517_s11, 3  ;;  %s2519_s25 = ssub.s32 (%p4088_p6), 3, %s4736_s12 }
  0x64   : > { %v1055_v10 = vsub.f32 %v4314_v56, %v1054_v2  ;;  %3437 = vmatprep.subr.mxu0 %v1054_v2  ;;  %v4348_v11 = vsub.f32 %v575_v0, %v4331_v3  ;;  %v4350_v12 = vand.u32 4294901760, %v581_v5  ;;  %v584_v13 = vsel %vm564_vm1, %v537_v1, 0  ;;  %v544_v53 = vld [vmem:[%s4304_s10 + $0x68] sm:$0xff]  ;;  %s519_s23 = scalar_lea.vmem %s5027_s2, %s3015_s18  ;;  %s3036_s27 = sshll.u32 (%p4088_p6), %s3959_s14, 4 }
  0x65   : > { %v733_v14 = vand.u32 4294901760, %v4336_v6  ;;  %v743_v15 = vand.u32 4294901760, %v4339_v7  ;;  %v753_v16 = vand.u32 4294901760, %v4342_v8  ;;  %v4357_v17 = vsub.f32 %v578_v4, %v4344_v9  ;;  %p2520_p7 = scmp.lt.s32.totalorder (%p4088_p6), %s2519_s25, 2  ;;  %s4821_s4 = scalar_lea.vmem (%p4088_p6), %s5028_s3, %s3036_s27  }
  0x66   : > { %v1056_v19 = vand.u32 4294901760, %v1055_v10  ;;  %v763_v20 = vand.u32 4294901760, %v4348_v11  ;;  %v4362_v21 = vsub.f32 %v581_v5, %v4350_v12  ;;  %v4364_v22 = vand.u32 4294901760, %v584_v13 }
  0x67   : > { %3389 = vmatprep.mubr.f32.mxu0 %v733_v14  ;;  %v734_v23 = vsub.f32 %v4336_v6, %v733_v14  ;;  %v744_v24 = vsub.f32 %v4339_v7, %v743_v15  ;;  %v754_v25 = vsub.f32 %v4342_v8, %v753_v16  ;;  %v773_v26 = vand.u32 4294901760, %v4357_v17 }
  0x68   : > { %3390 = vmatmul.mubr.f32.vlgmr.msra.gmra.mrb[0].mxu0 %v743_v15  ;;  %3287 = vmatprep.subr.mxu1 %v1056_v19  ;;  %v764_v27 = vsub.f32 %v4348_v11, %v763_v20  ;;  %v783_v28 = vand.u32 4294901760, %v4362_v21  ;;  %v4373_v29 = vsub.f32 %v584_v13, %v4364_v22  ;;  %v587_v30 = vsel %vm564_vm1, %v538_v18, 0 }
  0x69   : > { %v735_v34 = vand.u32 4294901760, %v734_v23  ;;  %3392 = vmatprep.mubr.f32.mxu0 %v753_v16  ;;  %v745_v35 = vand.u32 4294901760, %v744_v24  ;;  %3438 = vmatpush3.msra.mxu0 %v1054_v2  ;;  %v755_v36 = vand.u32 4294901760, %v754_v25  ;;  %v774_v37 = vsub.f32 %v4357_v17, %v773_v26  ;;  %v545_v2 = vld [vmem:[%s4304_s10 + $0x70] sm:$0xff]  ;;  %v546_v25 = vld [vmem:[%s4304_s10 + $0x78] sm:$0xff] }
  0x6a   : > { %v765_v38 = vand.u32 4294901760, %v764_v27  ;;  %v793_v39 = vand.u32 4294901760, %v4373_v29  ;;  %v784_v40 = vsub.f32 %v4362_v21, %v783_v28  ;;  %v4382_v41 = vand.u32 4294901760, %v587_v30  ;;  %3487 = vmatprep.subr.mxu0 %v4301_v50 }
  0x6b   : > { %3239 = vmatprep.mubr.f32.mxu1 %v735_v34  ;;  %v775_v44 = vand.u32 4294901760, %v774_v37  ;;  %v590_v45 = vsel %vm564_vm1, %v539_v31, 0  ;;  %v593_v46 = vsel %vm564_vm1, %v540_v32, 0  ;;  %v596_v47 = vsel %vm564_vm1, %v541_v33, 0  ;;  %v547_v33 = vld [vmem:[%s4304_s10 + $0x80] sm:$0xff]  ;;  %v548_v37 = vld [vmem:[%s4304_s10 + $0x88] sm:$0xff] }
  0x6c   : > { %3240 = vmatmul.mubr.f32.vlgmr.msra.gmra.mrb[0].mxu1 %v745_v35  ;;  %3393 = vmatmul.mubr.f32.gmra.mrb[2].mxu0 %v763_v20  ;;  %v785_v48 = vand.u32 4294901760, %v784_v40  ;;  %v4391_v49 = vsub.f32 %v587_v30, %v4382_v41  ;;  %v794_v51 = vsub.f32 %v4373_v29, %v793_v39  ;;  %v4394_v52 = vand.u32 4294901760, %v590_v45  ;;  %v549_v40 = vld [vmem:[%s4304_s10 + $0x90] sm:$0xff] }
  0x6d   : > { %3288 = vmatpush3.msra.mxu1 %v1056_v19  ;;  %3242 = vmatprep.mubr.f32.mxu1 %v755_v36  ;;  %v4397_v54 = vand.u32 4294901760, %v593_v46  ;;  %v4399_v55 = vand.u32 4294901760, %v596_v47  ;;  %v599_v57 = vsel %vm564_vm1, %v542_v42, 0  ;;  %v602_v58 = vsel %vm564_vm1, %v543_v43, 0 }
  0x6e   : > { %5056 = vst [vmem:[#allocation4_spill] sm:$0xff] %v4391_v49  ;;  %3395 = vmatprep.mubr.f32.mxu0 %v773_v26  ;;  %v803_v59 = vand.u32 4294901760, %v4391_v49  ;;  %v795_v60 = vand.u32 4294901760, %v794_v51  ;;  %v4405_v0 = vsub.f32 %v590_v45, %v4394_v52  ;;  %v4407_v1 = vand.u32 4294901760, %v599_v57  ;;  %3337 = vmatprep.subr.mxu1 %v4314_v56 }
  0x6f   : > { %v4412_v4 = vsub.f32 %v593_v46, %v4397_v54  ;;  %v4415_v5 = vsub.f32 %v596_v47, %v4399_v55  ;;  %v4417_v10 = vand.u32 4294901760, %v602_v58  ;;  %v605_v13 = vsel %vm564_vm1, %v544_v53, 0  ;;  %v550_v46 = vld [vmem:[%s4304_s10 + $0x98] sm:$0xff] }
  0x70   : > { %5057 = vst [vmem:[#allocation5_spill] sm:$0xff] %v4405_v0  ;;  %3243 = vmatmul.mubr.f32.gmra.mrb[2].mxu1 %v765_v38  ;;  %3396 = vmatmul.mubr.f32.gmra.mrb[4].mxu0 %v783_v28  ;;  %v813_v14 = vand.u32 4294901760, %v4405_v0  ;;  %v804_v15 = vsub.f32 %v4391_v49, %v803_v59  ;;  %v4423_v16 = vsub.f32 %v599_v57, %v4407_v1  ;;  %v4425_v18 = vand.u32 4294901760, %v605_v13  ;;  %v551_v57 = vld [vmem:[%s4304_s10 + $0xa0] sm:$0xff] }
  0x71   : > { %5058 = vst [vmem:[#allocation6_spill] sm:$0xff] %v4412_v4  ;;  %5059 = vst [vmem:[#allocation7_spill] sm:$0xff] %v4415_v5  ;;  %3245 = vmatprep.mubr.f32.mxu1 %v775_v44  ;;  %3398 = vmatprep.mubr.f32.mxu0 %v793_v39  ;;  %v823_v19 = vand.u32 4294901760, %v4412_v4  ;;  %v833_v20 = vand.u32 4294901760, %v4415_v5  ;;  %v4430_v23 = vsub.f32 %v602_v58, %v4417_v10  ;;  %v608_v24 = vsel %vm564_vm1, %v545_v2, 0 }
  0x72   : > { %5060 = vst [vmem:[#allocation8_spill] sm:$0xff] %v4423_v16  ;;  %v814_v26 = vsub.f32 %v4405_v0, %v813_v14  ;;  %v843_v27 = vand.u32 4294901760, %v4423_v16  ;;  %v4437_v28 = vsub.f32 %v605_v13, %v4425_v18  ;;  %v4441_v32 = vand.u32 4294901760, %v608_v24  ;;  %v561_v0 = vld [vmem:[%s4304_s10 + $0xf0] sm:$0xff] }
  0x73   : > { %5061 = vst [vmem:[#allocation9_spill] sm:$0xff] %v4430_v23  ;;  %v824_v30 = vsub.f32 %v4412_v4, %v823_v19  ;;  %v834_v31 = vsub.f32 %v4415_v5, %v833_v20  ;;  %v805_v34 = vand.u32 4294901760, %v804_v15  ;;  %v853_v35 = vand.u32 4294901760, %v4430_v23 }
  0x74   : > { %5062 = vst [vmem:[#allocation10_spill] sm:$0xff] %v4437_v28  ;;  %3246 = vmatmul.mubr.f32.gmra.mrb[4].mxu1 %v785_v48  ;;  %3399 = vmatmul.mubr.f32.gmra.mrb[6].mxu0 %v803_v59  ;;  %v611_v36 = vsel %vm564_vm1, %v546_v25, 0  ;;  %v815_v38 = vand.u32 4294901760, %v814_v26  ;;  %v4448_v39 = vsub.f32 %v608_v24, %v4441_v32  ;;  %v844_v42 = vsub.f32 %v4423_v16, %v843_v27  ;;  %v552_v24 = vld [vmem:[%s4304_s10 + $0xa8] sm:$0xff] }
  0x75   : > { %3248 = vmatprep.mubr.f32.mxu1 %v795_v60  ;;  %3401 = vmatprep.mubr.f32.mxu0 %v813_v14  ;;  %v863_v43 = vand.u32 4294901760, %v4437_v28  ;;  %v4453_v44 = vand.u32 4294901760, %v611_v36  ;;  %v614_v45 = vsel %vm564_vm1, %v547_v33, 0  ;;  %v825_v47 = vand.u32 4294901760, %v824_v30  ;;  %v553_v33 = vld [vmem:[%s4304_s10 + $0xb0] sm:$0xff] }
  0x76   : > { %5063 = vst [vmem:[#allocation11_spill] sm:$0xff] %v4448_v39  ;;  %v835_v48 = vand.u32 4294901760, %v834_v31  ;;  %v4457_v51 = vand.u32 4294901760, %v614_v45  ;;  %v617_v53 = vsel %vm564_vm1, %v548_v37, 0  ;;  %v854_v58 = vsub.f32 %v4430_v23, %v853_v35 }
  0x77   : > { %v4463_v59 = vsub.f32 %v611_v36, %v4453_v44  ;;  %v4465_v60 = vand.u32 4294901760, %v617_v53  ;;  %v620_v2 = vsel %vm564_vm1, %v549_v40, 0  ;;  %v873_v13 = vand.u32 4294901760, %v4448_v39 }
  0x78   : > { %3249 = vmatmul.mubr.f32.gmra.mrb[6].mxu1 %v805_v34  ;;  %3402 = vmatmul.mubr.f32.gmra.mrb[8].mxu0 %v823_v19  ;;  %v4470_v14 = vsub.f32 %v614_v45, %v4457_v51  ;;  %v4472_v15 = vand.u32 4294901760, %v620_v2  ;;  %v623_v19 = vsel %vm564_vm1, %v550_v46, 0  ;;  %v626_v25 = vsel %vm564_vm1, %v551_v57, 0 }
  0x79   : > { %5064 = vst [vmem:[#allocation12_spill] sm:$0xff] %v4463_v59  ;;  %3251 = vmatprep.mubr.f32.mxu1 %v815_v38  ;;  %3404 = vmatprep.mubr.f32.mxu0 %v833_v20  ;;  %v845_v26 = vand.u32 4294901760, %v844_v42  ;;  %v864_v30 = vsub.f32 %v4437_v28, %v863_v43  ;;  %v883_v31 = vand.u32 4294901760, %v4463_v59  ;;  %v855_v20 = vand.u32 4294901760, %v854_v58 }
  0x7a   : > { %5065 = vst [vmem:[#allocation13_spill] sm:$0xff] %v4470_v14  ;;  %v4481_v34 = vsub.f32 %v617_v53, %v4465_v60  ;;  %v4483_v36 = vand.u32 4294901760, %v623_v19  ;;  %v629_v37 = vsel %vm564_vm1, %v552_v24, 0  ;;  %v874_v38 = vsub.f32 %v4448_v39, %v873_v13  ;;  %v556_v39 = vld [vmem:[%s4304_s10 + $0xc8] sm:$0xff] }
  0x7b   : > { %v893_v40 = vand.u32 4294901760, %v4470_v14  ;;  %v4489_v42 = vsub.f32 %v620_v2, %v4472_v15  ;;  %v4491_v45 = vand.u32 4294901760, %v626_v25  ;;  %v632_v46 = vsel %vm564_vm1, %v553_v33, 0 }
  0x7c   : > { %3252 = vmatmul.mubr.f32.gmra.mrb[8].mxu1 %v825_v47  ;;  %3405 = vmatmul.mubr.f32.gmra.mrb[10].mxu0 %v843_v27  ;;  %5066 = vst [vmem:[#allocation14_spill] sm:$0xff] %v4481_v34  ;;  %v554_v27 = vld [vmem:[%s4304_s10 + $0xb8] sm:$0xff]  ;;  %v865_v47 = vand.u32 4294901760, %v864_v30  ;;  %v884_v53 = vsub.f32 %v4463_v59, %v883_v31  ;;  %v4496_v57 = vand.u32 4294901760, %v629_v37  ;;  %v4501_v58 = vsub.f32 %v623_v19, %v4483_v36 }
  0x7d   : > { %3254 = vmatprep.mubr.f32.mxu1 %v835_v48  ;;  %3407 = vmatprep.mubr.f32.mxu0 %v853_v35  ;;  %5067 = vst [vmem:[#allocation15_spill] sm:$0xff] %v4489_v42  ;;  %v555_v48 = vld [vmem:[%s4304_s10 + $0xc0] sm:$0xff]  ;;  %v903_v35 = vand.u32 4294901760, %v4481_v34  ;;  %v4503_v2 = vand.u32 4294901760, %v632_v46  ;;  %v635_v24 = vsel %vm564_vm1, %v554_v27, 0  ;;  %v875_v30 = vand.u32 4294901760, %v874_v38 }
  0x7e   : > { %5068 = vst [vmem:[#allocation16_spill] sm:$0xff] %v4501_v58  ;;  %v894_v33 = vsub.f32 %v4470_v14, %v893_v40  ;;  %v913_v59 = vand.u32 4294901760, %v4489_v42  ;;  %v4514_v19 = vsub.f32 %v629_v37, %v4496_v57  ;;  %v885_v38 = vand.u32 4294901760, %v884_v53 }
  0x7f   : > { %v4517_v28 = vsub.f32 %v632_v46, %v4503_v2  ;;  %v923_v27 = vand.u32 4294901760, %v4501_v58  ;;  %v641_v23 = vsel %vm564_vm1, %v556_v39, 0 }
  0x80   : > { %3255 = vmatmul.mubr.f32.gmra.mrb[10].mxu1 %v845_v26  ;;  %3408 = vmatmul.mubr.f32.gmra.mrb[12].mxu0 %v863_v43  ;;  %v4509_v26 = vsub.f32 %v626_v25, %v4491_v45  ;;  %v638_v43 = vsel %vm564_vm1, %v555_v48, 0  ;;  %5070 = vst [vmem:[#allocation18_spill] sm:$0xff] %v4514_v19  ;;  %v904_v25 = vsub.f32 %v4481_v34, %v903_v35  ;;  %v895_v37 = vand.u32 4294901760, %v894_v33 }
  0x81   : > { %3257 = vmatprep.mubr.f32.mxu1 %v855_v20  ;;  %3410 = vmatprep.mubr.f32.mxu0 %v873_v13  ;;  %5071 = vst [vmem:[#allocation19_spill] sm:$0xff] %v4517_v28  ;;  %v4519_v20 = vand.u32 4294901760, %v635_v24  ;;  %v557_v13 = vld [vmem:[%s4304_s10 + $0xd0] sm:$0xff]  ;;  %v4524_v48 = vand.u32 4294901760, %v638_v43  ;;  %v914_v46 = vsub.f32 %v4489_v42, %v913_v59  ;;  %v943_v53 = vand.u32 4294901760, %v4514_v19 }
  0x82   : > { %5069 = vst [vmem:[#allocation17_spill] sm:$0xff] %v4509_v26  ;;  %v933_v14 = vand.u32 4294901760, %v4509_v26  ;;  %v953_v34 = vand.u32 4294901760, %v4517_v28  ;;  %v924_v33 = vsub.f32 %v4501_v58, %v923_v27 }
  0x83   : > { %v4534_v16 = vsub.f32 %v635_v24, %v4519_v20  ;;  %v4539_v39 = vsub.f32 %v638_v43, %v4524_v48  ;;  %v915_v42 = vand.u32 4294901760, %v914_v46 }
  0x84   : > { %3258 = vmatmul.mubr.f32.gmra.mrb[12].mxu1 %v865_v47  ;;  %3411 = vmatmul.mubr.f32.gmra.mrb[14].mxu0 %v883_v31  ;;  %v644_v47 = vsel %vm564_vm1, %v557_v13, 0  ;;  %v558_v31 = vld [vmem:[%s4304_s10 + $0xd8] sm:$0xff]  ;;  %v4541_v13 = vand.u32 4294901760, %v641_v23  ;;  %v934_v5 = vsub.f32 %v4509_v26, %v933_v14  ;;  %v954_v43 = vsub.f32 %v4517_v28, %v953_v34 }
  0x85   : > { %3260 = vmatprep.mubr.f32.mxu1 %v875_v30  ;;  %3413 = vmatprep.mubr.f32.mxu0 %v893_v40  ;;  %5072 = vst [vmem:[#allocation20_spill] sm:$0xff] %v4534_v16  ;;  %v559_v30 = vld [vmem:[%s4304_s10 + $0xe0] sm:$0xff]  ;;  %v905_v40 = vand.u32 4294901760, %v904_v25  ;;  %5073 = vst [vmem:[#allocation21_spill] sm:$0xff] %v4539_v39  ;;  %v4544_v4 = vand.u32 4294901760, %v644_v47  ;;  %v647_v24 = vsel %vm564_vm1, %v558_v31, 0  ;;  %v944_v25 = vsub.f32 %v4514_v19, %v943_v53 }
  0x86   : > { %v963_v58 = vand.u32 4294901760, %v4534_v16  ;;  %v4555_v46 = vsub.f32 %v641_v23, %v4541_v13  ;;  %v4557_v31 = vand.u32 4294901760, %v647_v24  ;;  %v955_v49 = vand.u32 4294901760, %v954_v43 }
  0x87   : > { %v4560_v19 = vsub.f32 %v644_v47, %v4544_v4 }
  0x88   : > { %3261 = vmatmul.mubr.f32.gmra.mrb[14].mxu1 %v885_v38  ;;  %3414 = vmatmul.mubr.f32.gmra.mrb[16].mxu0 %v903_v35  ;;  %v650_v35 = vsel %vm564_vm1, %v559_v30, 0  ;;  %v560_v38 = vld [vmem:[%s4304_s10 + $0xe8] sm:$0xff]  ;;  %v935_v30 = vand.u32 4294901760, %v934_v5  ;;  %v964_v23 = vsub.f32 %v4534_v16, %v963_v58 }
  0x89   : > { %3263 = vmatprep.mubr.f32.mxu1 %v895_v37  ;;  %3416 = vmatprep.mubr.f32.mxu0 %v913_v59  ;;  %v925_v59 = vand.u32 4294901760, %v924_v33  ;;  %v973_v37 = vand.u32 4294901760, %v4539_v39  ;;  %v4562_v26 = vand.u32 4294901760, %v650_v35  ;;  %v653_v28 = vsel %vm564_vm1, %v560_v38, 0 }
  0x8a   : > { %v945_v33 = vand.u32 4294901760, %v944_v25  ;;  %v4573_v47 = vand.u32 4294901760, %v653_v28  ;;  %v965_v43 = vand.u32 4294901760, %v964_v23 }
  0x8b   : > { %v974_v5 = vsub.f32 %v4539_v39, %v973_v37  ;;  %v4577_v38 = vsub.f32 %v650_v35, %v4562_v26 }
  0x8c   : > { %3264 = vmatmul.mubr.f32.gmra.mrb[16].mxu1 %v905_v40  ;;  %3417 = vmatmul.mubr.f32.gmra.mrb[18].mxu0 %v923_v27  ;;  %v656_v27 = vsel %vm564_vm1, %v561_v0, 0  ;;  %v562_v40 = vld [vmem:[%s4304_s10 + $0xf8] sm:$0xff]  ;;  %v993_v0 = vand.u32 4294901760, %v4560_v19  ;;  %v4585_v39 = vsub.f32 %v653_v28, %v4573_v47 }
  0x8d   : > { %3266 = vmatprep.mubr.f32.mxu1 %v915_v42  ;;  %3419 = vmatprep.mubr.f32.mxu0 %v933_v14  ;;  %v983_v42 = vand.u32 4294901760, %v4555_v46  ;;  %v4571_v14 = vsub.f32 %v647_v24, %v4557_v31  ;;  %v4579_v25 = vand.u32 4294901760, %v656_v27  ;;  %v975_v35 = vand.u32 4294901760, %v974_v5 }
  0x8e   : > { %v1013_v16 = vand.u32 4294901760, %v4577_v38  ;;  %v1023_v28 = vand.u32 4294901760, %v4585_v39 }
  0x8f   : > { %v1003_v24 = vand.u32 4294901760, %v4571_v14 }
  0x90   : > { %3267 = vmatmul.mubr.f32.gmra.mrb[18].mxu1 %v925_v59  ;;  %3420 = vmatmul.mubr.f32.gmra.mrb[20].mxu0 %v943_v53  ;;  %v659_v53 = vsel %vm564_vm1, %v562_v40, 0  ;;  %v984_v59 = vsub.f32 %v4555_v46, %v983_v42  ;;  %v4592_v40 = vsub.f32 %v656_v27, %v4579_v25 }
  0x91   : > { %3269 = vmatprep.mubr.f32.mxu1 %v935_v30  ;;  %3422 = vmatprep.mubr.f32.mxu0 %v953_v34  ;;  %v4587_v34 = vand.u32 4294901760, %v659_v53  ;;  %v994_v30 = vsub.f32 %v4560_v19, %v993_v0 }
  0x92   : > { %v1033_v5 = vand.u32 4294901760, %v4592_v40 }
  0x93   : > { %v4597_v23 = vsub.f32 %v659_v53, %v4587_v34 }
  0x94   : > { %3270 = vmatmul.mubr.f32.gmra.mrb[20].mxu1 %v945_v33  ;;  %3423 = vmatmul.mubr.f32.gmra.mrb[22].mxu0 %v963_v58  ;;  %v985_v58 = vand.u32 4294901760, %v984_v59  ;;  %v1004_v33 = vsub.f32 %v4571_v14, %v1003_v24  ;;  %v1034_v53 = vsub.f32 %v4592_v40, %v1033_v5 }
  0x95   : > { %3272 = vmatprep.mubr.f32.mxu1 %v955_v49  ;;  %3425 = vmatprep.mubr.f32.mxu0 %v973_v37  ;;  %v995_v49 = vand.u32 4294901760, %v994_v30  ;;  %v1014_v37 = vsub.f32 %v4577_v38, %v1013_v16 }
  0x96   : > { %v1005_v27 = vand.u32 4294901760, %v1004_v33  ;;  %v1035_v30 = vand.u32 4294901760, %v1034_v53 }
  0x97   : > { %v1015_v59 = vand.u32 4294901760, %v1014_v37 }
  0x98   : > { %3273 = vmatmul.mubr.f32.gmra.mrb[22].mxu1 %v965_v43  ;;  %3426 = vmatmul.mubr.f32.gmra.mrb[24].mxu0 %v983_v42  ;;  %v1024_v42 = vsub.f32 %v4585_v39, %v1023_v28  ;;  %v1043_v43 = vand.u32 4294901760, %v4597_v23 }
  0x99   : > { %3275 = vmatprep.mubr.f32.mxu1 %v975_v35  ;;  %3428 = vmatprep.mubr.f32.mxu0 %v993_v0 }
  0x9a   : > { %v1025_v0 = vand.u32 4294901760, %v1024_v42  ;;  %v1044_v35 = vsub.f32 %v4597_v23, %v1043_v43 }
  0x9c   : > { %3276 = vmatmul.mubr.f32.gmra.mrb[24].mxu1 %v985_v58  ;;  %3429 = vmatmul.mubr.f32.gmra.mrb[26].mxu0 %v1003_v24  ;;  %v1045_v24 = vand.u32 4294901760, %v1044_v35 }
  0x9d   : > { %3278 = vmatprep.mubr.f32.mxu1 %v995_v49  ;;  %3431 = vmatprep.mubr.f32.mxu0 %v1013_v16 }
  0xa0   : > { %3279 = vmatmul.mubr.f32.gmra.mrb[26].mxu1 %v1005_v27  ;;  %3432 = vmatmul.mubr.f32.gmra.mrb[28].mxu0 %v1023_v28 }
  0xa1   : > { %3281 = vmatprep.mubr.f32.mxu1 %v1015_v59  ;;  %3434 = vmatprep.mubr.f32.mxu0 %v1033_v5 }
  0xa4   : > { %3282 = vmatmul.mubr.f32.gmra.mrb[28].mxu1 %v1025_v0  ;;  %3435 = vmatmul.mubr.f32.gmra.mrb[30].mxu0 %v1043_v43 }
  0xa5   : > { %3284 = vmatprep.mubr.f32.mxu1 %v1035_v30  ;;  %3439 = vmatprep.mubr.f32.mxu0 %v4321_v61 }
  0xa8   : > { %3285 = vmatmul.mubr.f32.gmra.mrb[30].mxu1 %v1045_v24  ;;  %3440 = vmatmul.mubr.f32.vlgmr.msra.gmra.mrb[0].mxu0 %v4323_v62 }
  0xa9   : > { %3289 = vmatprep.mubr.f32.mxu1 %v4321_v61  ;;  %3442 = vmatprep.mubr.f32.mxu0 %v4326_v63 }
  0xaa   : > { %3488 = vmatpush3.msra.mxu0 %v4301_v50  ;;  %v5074_v50 = vld [vmem:[#allocation4_spill] sm:$0xff] }
  0xac   : > { %3290 = vmatmul.mubr.f32.vlgmr.msra.gmra.mrb[0].mxu1 %v4323_v62  ;;  %3443 = vmatmul.mubr.f32.gmra.mrb[2].mxu0 %v4331_v3 }
  0xad   : > { %3338 = vmatpush3.msra.mxu1 %v4314_v56  ;;  %3292 = vmatprep.mubr.f32.mxu1 %v4326_v63  ;;  %v5075_v56 = vld [vmem:[#allocation5_spill] sm:$0xff] }
  0xae   : > { %3445 = vmatprep.mubr.f32.mxu0 %v4344_v9 }
  0xb0   : > { %3293 = vmatmul.mubr.f32.gmra.mrb[2].mxu1 %v4331_v3  ;;  %3446 = vmatmul.mubr.f32.gmra.mrb[4].mxu0 %v4350_v12 }
  0xb1   : > { %3295 = vmatprep.mubr.f32.mxu1 %v4344_v9  ;;  %3448 = vmatprep.mubr.f32.mxu0 %v4364_v22 }
  0xb4   : > { %3296 = vmatmul.mubr.f32.gmra.mrb[4].mxu1 %v4350_v12  ;;  %3449 = vmatmul.mubr.f32.gmra.mrb[6].mxu0 %v4382_v41 }
  0xb5   : > { %3298 = vmatprep.mubr.f32.mxu1 %v4364_v22  ;;  %3451 = vmatprep.mubr.f32.mxu0 %v4394_v52 }
  0xb8   : > { %3299 = vmatmul.mubr.f32.gmra.mrb[6].mxu1 %v4382_v41  ;;  %3452 = vmatmul.mubr.f32.gmra.mrb[8].mxu0 %v4397_v54 }
  0xb9   : > { %3301 = vmatprep.mubr.f32.mxu1 %v4394_v52  ;;  %3454 = vmatprep.mubr.f32.mxu0 %v4399_v55 }
  0xbc   : > { %3302 = vmatmul.mubr.f32.gmra.mrb[8].mxu1 %v4397_v54  ;;  %3455 = vmatmul.mubr.f32.gmra.mrb[10].mxu0 %v4407_v1 }
  0xbd   : > { %3304 = vmatprep.mubr.f32.mxu1 %v4399_v55  ;;  %3457 = vmatprep.mubr.f32.mxu0 %v4417_v10 }
  0xc0   : > { %3305 = vmatmul.mubr.f32.gmra.mrb[10].mxu1 %v4407_v1  ;;  %3458 = vmatmul.mubr.f32.gmra.mrb[12].mxu0 %v4425_v18 }
  0xc1   : > { %3307 = vmatprep.mubr.f32.mxu1 %v4417_v10  ;;  %3460 = vmatprep.mubr.f32.mxu0 %v4441_v32 }
  0xc4   : > { %3308 = vmatmul.mubr.f32.gmra.mrb[12].mxu1 %v4425_v18  ;;  %3461 = vmatmul.mubr.f32.gmra.mrb[14].mxu0 %v4453_v44 }
  0xc5   : > { %3310 = vmatprep.mubr.f32.mxu1 %v4441_v32  ;;  %3463 = vmatprep.mubr.f32.mxu0 %v4457_v51 }
  0xc8   : > { %3311 = vmatmul.mubr.f32.gmra.mrb[14].mxu1 %v4453_v44  ;;  %3464 = vmatmul.mubr.f32.gmra.mrb[16].mxu0 %v4465_v60 }
  0xc9   : > { %3313 = vmatprep.mubr.f32.mxu1 %v4457_v51  ;;  %3466 = vmatprep.mubr.f32.mxu0 %v4472_v15 }
  0xcc   : > { %3314 = vmatmul.mubr.f32.gmra.mrb[16].mxu1 %v4465_v60  ;;  %3467 = vmatmul.mubr.f32.gmra.mrb[18].mxu0 %v4483_v36 }
  0xcd   : > { %3316 = vmatprep.mubr.f32.mxu1 %v4472_v15  ;;  %3469 = vmatprep.mubr.f32.mxu0 %v4491_v45 }
  0xd0   : > { %3317 = vmatmul.mubr.f32.gmra.mrb[18].mxu1 %v4483_v36  ;;  %3470 = vmatmul.mubr.f32.gmra.mrb[20].mxu0 %v4496_v57 }
  0xd1   : > { %3319 = vmatprep.mubr.f32.mxu1 %v4491_v45  ;;  %3472 = vmatprep.mubr.f32.mxu0 %v4503_v2 }
  0xd4   : > { %3320 = vmatmul.mubr.f32.gmra.mrb[20].mxu1 %v4496_v57  ;;  %3473 = vmatmul.mubr.f32.gmra.mrb[22].mxu0 %v4519_v20 }
  0xd5   : > { %3322 = vmatprep.mubr.f32.mxu1 %v4503_v2  ;;  %3475 = vmatprep.mubr.f32.mxu0 %v4524_v48 }
  0xd8   : > { %3323 = vmatmul.mubr.f32.gmra.mrb[22].mxu1 %v4519_v20  ;;  %3476 = vmatmul.mubr.f32.gmra.mrb[24].mxu0 %v4541_v13 }
  0xd9   : > { %3325 = vmatprep.mubr.f32.mxu1 %v4524_v48  ;;  %3478 = vmatprep.mubr.f32.mxu0 %v4544_v4 }
  0xdc   : > { %3326 = vmatmul.mubr.f32.gmra.mrb[24].mxu1 %v4541_v13  ;;  %3479 = vmatmul.mubr.f32.gmra.mrb[26].mxu0 %v4557_v31 }
  0xdd   : > { %3328 = vmatprep.mubr.f32.mxu1 %v4544_v4  ;;  %3481 = vmatprep.mubr.f32.mxu0 %v4562_v26 }
  0xe0   : > { %3329 = vmatmul.mubr.f32.gmra.mrb[26].mxu1 %v4557_v31  ;;  %3482 = vmatmul.mubr.f32.gmra.mrb[28].mxu0 %v4573_v47 }
  0xe1   : > { %3331 = vmatprep.mubr.f32.mxu1 %v4562_v26  ;;  %3484 = vmatprep.mubr.f32.mxu0 %v4579_v25 }
  0xe4   : > { %3332 = vmatmul.mubr.f32.gmra.mrb[28].mxu1 %v4573_v47  ;;  %3485 = vmatmul.mubr.f32.gmra.mrb[30].mxu0 %v4587_v34 }
  0xe5   : > { %3334 = vmatprep.mubr.f32.mxu1 %v4579_v25  ;;  %3489 = vmatprep.mubr.f32.mxu0 %v4321_v61  ;;  %v5076_v61 = vld [vmem:[#allocation6_spill] sm:$0xff] }
  0xe8   : > { %3335 = vmatmul.mubr.f32.gmra.mrb[30].mxu1 %v4587_v34  ;;  %3490 = vmatmul.mubr.f32.vlgmr.msra.gmra.mrb[0].mxu0 %v4323_v62  ;;  %v5077_v62 = vld [vmem:[#allocation7_spill] sm:$0xff] }
  0xe9   : > { %3339 = vmatprep.mubr.f32.mxu1 %v4336_v6  ;;  %3492 = vmatprep.mubr.f32.mxu0 %v4326_v63  ;;  %v5078_v63 = vld [vmem:[#allocation8_spill] sm:$0xff]  ;;  %v5080_v6 = vld [vmem:[#allocation10_spill] sm:$0xff] }
  0xec   : > { %3340 = vmatmul.mubr.f32.vlgmr.msra.gmra.mrb[0].mxu1 %v4339_v7  ;;  %3493 = vmatmul.mubr.f32.gmra.mrb[2].mxu0 %v4331_v3  ;;  %v5079_v3 = vld [vmem:[#allocation9_spill] sm:$0xff]  ;;  %v5081_v7 = vld [vmem:[#allocation11_spill] sm:$0xff] }
  0xed   : > { %3342 = vmatprep.mubr.f32.mxu1 %v4342_v8  ;;  %3495 = vmatprep.mubr.f32.mxu0 %v4344_v9  ;;  %v5082_v8 = vld [vmem:[#allocation12_spill] sm:$0xff]  ;;  %v5083_v9 = vld [vmem:[#allocation13_spill] sm:$0xff] }
  0xf0   : > { %3343 = vmatmul.mubr.f32.gmra.mrb[2].mxu1 %v4348_v11  ;;  %3496 = vmatmul.mubr.f32.gmra.mrb[4].mxu0 %v4350_v12  ;;  %v5084_v11 = vld [vmem:[#allocation14_spill] sm:$0xff]  ;;  %v5085_v12 = vld [vmem:[#allocation15_spill] sm:$0xff] }
  0xf1   : > { %3345 = vmatprep.mubr.f32.mxu1 %v4357_v17  ;;  %3498 = vmatprep.mubr.f32.mxu0 %v4364_v22  ;;  %v5086_v17 = vld [vmem:[#allocation16_spill] sm:$0xff]  ;;  %v5088_v22 = vld [vmem:[#allocation18_spill] sm:$0xff] }
  0xf4   : > { %3346 = vmatmul.mubr.f32.gmra.mrb[4].mxu1 %v4362_v21  ;;  %3499 = vmatmul.mubr.f32.gmra.mrb[6].mxu0 %v4382_v41  ;;  %v5087_v21 = vld [vmem:[#allocation17_spill] sm:$0xff]  ;;  %v5090_v41 = vld [vmem:[#allocation20_spill] sm:$0xff] }
  0xf5   : > { %3348 = vmatprep.mubr.f32.mxu1 %v4373_v29  ;;  %3501 = vmatprep.mubr.f32.mxu0 %v4394_v52  ;;  %v5089_v29 = vld [vmem:[#allocation19_spill] sm:$0xff]  ;;  %v5091_v52 = vld [vmem:[#allocation21_spill] sm:$0xff] }
  0xf8   : > { %3349 = vmatmul.mubr.f32.gmra.mrb[6].mxu1 %v5074_v50  ;;  %3502 = vmatmul.mubr.f32.gmra.mrb[8].mxu0 %v4397_v54 }
  0xf9   : > { %3351 = vmatprep.mubr.f32.mxu1 %v5075_v56  ;;  %3504 = vmatprep.mubr.f32.mxu0 %v4399_v55 }
  0xfc   : > { %3352 = vmatmul.mubr.f32.gmra.mrb[8].mxu1 %v5076_v61  ;;  %3505 = vmatmul.mubr.f32.gmra.mrb[10].mxu0 %v4407_v1 }
  0xfd   : > { %3354 = vmatprep.mubr.f32.mxu1 %v5077_v62  ;;  %3507 = vmatprep.mubr.f32.mxu0 %v4417_v10 }
 0x100   : > { %3355 = vmatmul.mubr.f32.gmra.mrb[10].mxu1 %v5078_v63  ;;  %3508 = vmatmul.mubr.f32.gmra.mrb[12].mxu0 %v4425_v18 }
 0x101   : > { %3357 = vmatprep.mubr.f32.mxu1 %v5079_v3  ;;  %3510 = vmatprep.mubr.f32.mxu0 %v4441_v32  ;;  %v4745_v32 = vld [vmem:[%s519_s23] sm:$0xff] }
 0x104   : > { %3358 = vmatmul.mubr.f32.gmra.mrb[12].mxu1 %v5080_v6  ;;  %3511 = vmatmul.mubr.f32.gmra.mrb[14].mxu0 %v4453_v44 }
 0x105   : > { %3360 = vmatprep.mubr.f32.mxu1 %v5081_v7  ;;  %3513 = vmatprep.mubr.f32.mxu0 %v4457_v51 }
 0x108   : > { %3361 = vmatmul.mubr.f32.gmra.mrb[14].mxu1 %v5082_v8  ;;  %3514 = vmatmul.mubr.f32.gmra.mrb[16].mxu0 %v4465_v60 }
 0x109   : > { %3363 = vmatprep.mubr.f32.mxu1 %v5083_v9  ;;  %3516 = vmatprep.mubr.f32.mxu0 %v4472_v15 }
 0x10c   : > { %3364 = vmatmul.mubr.f32.gmra.mrb[16].mxu1 %v5084_v11  ;;  %3517 = vmatmul.mubr.f32.gmra.mrb[18].mxu0 %v4483_v36 }
 0x10d   : > { %3366 = vmatprep.mubr.f32.mxu1 %v5085_v12  ;;  %3519 = vmatprep.mubr.f32.mxu0 %v4491_v45 }
 0x110   : > { %3367 = vmatmul.mubr.f32.gmra.mrb[18].mxu1 %v5086_v17  ;;  %3520 = vmatmul.mubr.f32.gmra.mrb[20].mxu0 %v4496_v57 }
 0x111   : > { %3369 = vmatprep.mubr.f32.mxu1 %v5087_v21  ;;  %3522 = vmatprep.mubr.f32.mxu0 %v4503_v2 }
 0x114   : > { %3370 = vmatmul.mubr.f32.gmra.mrb[20].mxu1 %v5088_v22  ;;  %3523 = vmatmul.mubr.f32.gmra.mrb[22].mxu0 %v4519_v20 }
 0x115   : > { %3372 = vmatprep.mubr.f32.mxu1 %v5089_v29  ;;  %3525 = vmatprep.mubr.f32.mxu0 %v4524_v48 }
 0x118   : > { %3373 = vmatmul.mubr.f32.gmra.mrb[22].mxu1 %v5090_v41  ;;  %3526 = vmatmul.mubr.f32.gmra.mrb[24].mxu0 %v4541_v13 }
 0x119   : > { %3375 = vmatprep.mubr.f32.mxu1 %v5091_v52  ;;  %3528 = vmatprep.mubr.f32.mxu0 %v4544_v4  ;;  %v4743_v4 = vld [vmem:[%s519_s23 + $0x8] sm:$0xff] }
 0x11c   : > { %3376 = vmatmul.mubr.f32.gmra.mrb[24].mxu1 %v4555_v46  ;;  %3529 = vmatmul.mubr.f32.gmra.mrb[26].mxu0 %v4557_v31 }
 0x11d   : > { %3378 = vmatprep.mubr.f32.mxu1 %v4560_v19  ;;  %3531 = vmatprep.mubr.f32.mxu0 %v4562_v26 }
 0x120   : > { %3379 = vmatmul.mubr.f32.gmra.mrb[26].mxu1 %v4571_v14  ;;  %3532 = vmatmul.mubr.f32.gmra.mrb[28].mxu0 %v4573_v47 }
 0x121   : > { %3381 = vmatprep.mubr.f32.mxu1 %v4577_v38  ;;  %3534 = vmatprep.mubr.f32.mxu0 %v4579_v25 }
 0x124   : > { %3382 = vmatmul.mubr.f32.gmra.mrb[28].mxu1 %v4585_v39  ;;  %3535 = vmatmul.mubr.f32.gmra.mrb[30].mxu0 %v4587_v34 }
 0x125   : > { %3384 = vmatprep.mubr.f32.mxu1 %v4592_v40 }
 0x128   : > { %3385 = vmatmul.mubr.f32.gmra.mrb[30].mxu1 %v4597_v23 }
 0x1bb   : > { %v3491_v54 = vpop.f32.mrb[0].mxu0 }
 0x1bc   : > { %v2254_v55 = vpop.f32.mrb[1].mxu0 }
 0x1bf   : > { %v3341_v1 = vpop.f32.mrb[0].mxu1  ;;  %v3494_v10 = vpop.f32.mrb[2].mxu0 }
 0x1c0   : > { %v3537_v16 = vadd.f32 %v3491_v54, %v3341_v1  ;;  %v1383_v18 = vpop.f32.mrb[1].mxu1  ;;  %v2266_v44 = vpop.f32.mrb[3].mxu0 }
 0x1c1   : > { %v3538_v51 = vadd.f32 %v2254_v55, %v1383_v18 }
 0x1c2   : > { %v2447_v60 = vadd.f32 %v3537_v16, %v4743_v4 }
 0x1c3   : > { %v2446_v15 = vadd.f32 %v3538_v51, %v4745_v32  ;;  %v3344_v36 = vpop.f32.mrb[2].mxu1  ;;  %v3497_v45 = vpop.f32.mrb[4].mxu0 }
 0x1c4   : > { %2479 = vst [vmem:[%s4750_s24 + $0x8] sm:$0xff] %v2447_v60  ;;  %v3539_v57 = vadd.f32 %v3494_v10, %v3344_v36  ;;  %v1397_v2 = vpop.f32.mrb[3].mxu1  ;;  %v2278_v26 = vpop.f32.mrb[5].mxu0 }
 0x1c5   : > { %2478 = vst [vmem:[%s4750_s24] sm:$0xff] %v2446_v15  ;;  %v3540_v19 = vadd.f32 %v2266_v44, %v1397_v2 }
 0x1c6   : > { %v2449_v20 = vadd.f32 %v3539_v57, %v4743_v4 }
 0x1c7   : > { %v2448_v48 = vadd.f32 %v3540_v19, %v4745_v32  ;;  %v3347_v39 = vpop.f32.mrb[4].mxu1  ;;  %v3500_v13 = vpop.f32.mrb[6].mxu0 }
 0x1c8   : > { %2481 = vst [vmem:[%s4750_s24 + $0x18] sm:$0xff] %v2449_v20  ;;  %v3541_v46 = vadd.f32 %v3497_v45, %v3347_v39  ;;  %v1411_v31 = vpop.f32.mrb[5].mxu1  ;;  %v2290_v14 = vpop.f32.mrb[7].mxu0 }
 0x1c9   : > { %2480 = vst [vmem:[%s4750_s24 + $0x10] sm:$0xff] %v2448_v48  ;;  %v3542_v47 = vadd.f32 %v2278_v26, %v1411_v31 }
 0x1ca   : > { %v2451_v38 = vadd.f32 %v3541_v46, %v4743_v4 }
 0x1cb   : > { %v2450_v25 = vadd.f32 %v3542_v47, %v4745_v32  ;;  %v3350_v34 = vpop.f32.mrb[6].mxu1  ;;  %v3503_v40 = vpop.f32.mrb[8].mxu0 }
 0x1cc   : > { %2483 = vst [vmem:[%s4750_s24 + $0x28] sm:$0xff] %v2451_v38  ;;  %v3543_v58 = vadd.f32 %v3500_v13, %v3350_v34  ;;  %v1425_v33 = vpop.f32.mrb[7].mxu1  ;;  %v2302_v28 = vpop.f32.mrb[9].mxu0 }
 0x1cd   : > { %2482 = vst [vmem:[%s4750_s24 + $0x20] sm:$0xff] %v2450_v25  ;;  %v3544_v23 = vadd.f32 %v2290_v14, %v1425_v33 }
 0x1ce   : > { %v2453_v49 = vadd.f32 %v3543_v58, %v4743_v4 }
 0x1cf   : > { %v2452_v37 = vadd.f32 %v3544_v23, %v4745_v32  ;;  %v3353_v5 = vpop.f32.mrb[8].mxu1  ;;  %v3506_v27 = vpop.f32.mrb[10].mxu0 }
 0x1d0   : > { %2485 = vst [vmem:[%s4750_s24 + $0x38] sm:$0xff] %v2453_v49  ;;  %v3545_v42 = vadd.f32 %v3503_v40, %v3353_v5  ;;  %v1439_v43 = vpop.f32.mrb[9].mxu1  ;;  %v2314_v59 = vpop.f32.mrb[11].mxu0 }
 0x1d1   : > { %2484 = vst [vmem:[%s4750_s24 + $0x30] sm:$0xff] %v2452_v37  ;;  %v3546_v53 = vadd.f32 %v2302_v28, %v1439_v43 }
 0x1d2   : > { %v2455_v0 = vadd.f32 %v3545_v42, %v4743_v4 }
 0x1d3   : > { %v2454_v35 = vadd.f32 %v3546_v53, %v4745_v32  ;;  %v3356_v30 = vpop.f32.mrb[10].mxu1  ;;  %v3509_v24 = vpop.f32.mrb[12].mxu0 }
 0x1d4   : > { %2487 = vst [vmem:[%s4750_s24 + $0x48] sm:$0xff] %v2455_v0  ;;  %v3547_v50 = vadd.f32 %v3506_v27, %v3356_v30  ;;  %v1453_v56 = vpop.f32.mrb[11].mxu1  ;;  %v2326_v61 = vpop.f32.mrb[13].mxu0 }
 0x1d5   : > { %2486 = vst [vmem:[%s4750_s24 + $0x40] sm:$0xff] %v2454_v35  ;;  %v3548_v62 = vadd.f32 %v2314_v59, %v1453_v56 }
 0x1d6   : > { %v2457_v63 = vadd.f32 %v3547_v50, %v4743_v4 }
 0x1d7   : > { %v2456_v3 = vadd.f32 %v3548_v62, %v4745_v32  ;;  %v3359_v6 = vpop.f32.mrb[12].mxu1  ;;  %v3512_v7 = vpop.f32.mrb[14].mxu0 }
 0x1d8   : > { %2489 = vst [vmem:[%s4750_s24 + $0x58] sm:$0xff] %v2457_v63  ;;  %v3549_v8 = vadd.f32 %v3509_v24, %v3359_v6  ;;  %v1467_v9 = vpop.f32.mrb[13].mxu1  ;;  %v2338_v11 = vpop.f32.mrb[15].mxu0 }
 0x1d9   : > { %2488 = vst [vmem:[%s4750_s24 + $0x50] sm:$0xff] %v2456_v3  ;;  %v3550_v12 = vadd.f32 %v2326_v61, %v1467_v9 }
 0x1da   : > { %v2459_v17 = vadd.f32 %v3549_v8, %v4743_v4 }
 0x1db   : > { %v2458_v21 = vadd.f32 %v3550_v12, %v4745_v32  ;;  %v3362_v22 = vpop.f32.mrb[14].mxu1  ;;  %v3515_v29 = vpop.f32.mrb[16].mxu0 }
 0x1dc   : > { %2491 = vst [vmem:[%s4750_s24 + $0x68] sm:$0xff] %v2459_v17  ;;  %v3551_v41 = vadd.f32 %v3512_v7, %v3362_v22  ;;  %v1481_v52 = vpop.f32.mrb[15].mxu1  ;;  %v2350_v54 = vpop.f32.mrb[17].mxu0 }
 0x1dd   : > { %2490 = vst [vmem:[%s4750_s24 + $0x60] sm:$0xff] %v2458_v21  ;;  %v3552_v55 = vadd.f32 %v2338_v11, %v1481_v52 }
 0x1de   : > { %v2461_v1 = vadd.f32 %v3551_v41, %v4743_v4 }
 0x1df   : > { %v2460_v10 = vadd.f32 %v3552_v55, %v4745_v32  ;;  %v3365_v16 = vpop.f32.mrb[16].mxu1  ;;  %v3518_v18 = vpop.f32.mrb[18].mxu0 }
 0x1e0   : > { %2493 = vst [vmem:[%s4750_s24 + $0x78] sm:$0xff] %v2461_v1  ;;  %v3553_v44 = vadd.f32 %v3515_v29, %v3365_v16  ;;  %v1495_v51 = vpop.f32.mrb[17].mxu1  ;;  %v2362_v60 = vpop.f32.mrb[19].mxu0 }
 0x1e1   : > { %2492 = vst [vmem:[%s4750_s24 + $0x70] sm:$0xff] %v2460_v10  ;;  %v3554_v15 = vadd.f32 %v2350_v54, %v1495_v51 }
 0x1e2   : > { %v2463_v36 = vadd.f32 %v3553_v44, %v4743_v4 }
 0x1e3   : > { %v2462_v45 = vadd.f32 %v3554_v15, %v4745_v32  ;;  %v3368_v57 = vpop.f32.mrb[18].mxu1  ;;  %v3521_v2 = vpop.f32.mrb[20].mxu0 }
 0x1e4   : > { %2495 = vst [vmem:[%s4750_s24 + $0x88] sm:$0xff] %v2463_v36  ;;  %v3555_v26 = vadd.f32 %v3518_v18, %v3368_v57  ;;  %v1509_v19 = vpop.f32.mrb[19].mxu1  ;;  %v2374_v20 = vpop.f32.mrb[21].mxu0 }
 0x1e5   : > { %2494 = vst [vmem:[%s4750_s24 + $0x80] sm:$0xff] %v2462_v45  ;;  %v3556_v48 = vadd.f32 %v2362_v60, %v1509_v19 }
 0x1e6   : > { %v2465_v39 = vadd.f32 %v3555_v26, %v4743_v4 }
 0x1e7   : > { %v2464_v13 = vadd.f32 %v3556_v48, %v4745_v32  ;;  %v3371_v46 = vpop.f32.mrb[20].mxu1  ;;  %v3524_v31 = vpop.f32.mrb[22].mxu0 }
 0x1e8   : > { %2497 = vst [vmem:[%s4750_s24 + $0x98] sm:$0xff] %v2465_v39  ;;  %v3557_v14 = vadd.f32 %v3521_v2, %v3371_v46  ;;  %v1523_v47 = vpop.f32.mrb[21].mxu1  ;;  %v2386_v38 = vpop.f32.mrb[23].mxu0 }
 0x1e9   : > { %2496 = vst [vmem:[%s4750_s24 + $0x90] sm:$0xff] %v2464_v13  ;;  %v3558_v25 = vadd.f32 %v2374_v20, %v1523_v47 }
 0x1ea   : > { %v2467_v34 = vadd.f32 %v3557_v14, %v4743_v4 }
 0x1eb   : > { %v2466_v40 = vadd.f32 %v3558_v25, %v4745_v32  ;;  %v3374_v58 = vpop.f32.mrb[22].mxu1  ;;  %v3527_v33 = vpop.f32.mrb[24].mxu0 }
 0x1ec   : > { %2499 = vst [vmem:[%s4750_s24 + $0xa8] sm:$0xff] %v2467_v34  ;;  %v3559_v28 = vadd.f32 %v3524_v31, %v3374_v58  ;;  %v1537_v23 = vpop.f32.mrb[23].mxu1  ;;  %v2398_v49 = vpop.f32.mrb[25].mxu0 }
 0x1ed   : > { %2498 = vst [vmem:[%s4750_s24 + $0xa0] sm:$0xff] %v2466_v40  ;;  %v3560_v37 = vadd.f32 %v2386_v38, %v1537_v23 }
 0x1ee   : > { %v2469_v5 = vadd.f32 %v3559_v28, %v4743_v4 }
 0x1ef   : > { %v2468_v27 = vadd.f32 %v3560_v37, %v4745_v32  ;;  %v3377_v42 = vpop.f32.mrb[24].mxu1  ;;  %v3530_v43 = vpop.f32.mrb[26].mxu0 }
 0x1f0   : > { %2501 = vst [vmem:[%s4750_s24 + $0xb8] sm:$0xff] %v2469_v5  ;;  %v3561_v59 = vadd.f32 %v3527_v33, %v3377_v42  ;;  %v1551_v53 = vpop.f32.mrb[25].mxu1  ;;  %v2410_v0 = vpop.f32.mrb[27].mxu0 }
 0x1f1   : > { %2500 = vst [vmem:[%s4750_s24 + $0xb0] sm:$0xff] %v2468_v27  ;;  %v3562_v35 = vadd.f32 %v2398_v49, %v1551_v53 }
 0x1f2   : > { %v2471_v30 = vadd.f32 %v3561_v59, %v4743_v4 }
 0x1f3   : > { %v2470_v24 = vadd.f32 %v3562_v35, %v4745_v32  ;;  %v3380_v50 = vpop.f32.mrb[26].mxu1  ;;  %v3533_v56 = vpop.f32.mrb[28].mxu0 }
 0x1f4   : > { %2503 = vst [vmem:[%s4750_s24 + $0xc8] sm:$0xff] %v2471_v30  ;;  %v3563_v61 = vadd.f32 %v3530_v43, %v3380_v50  ;;  %v1565_v62 = vpop.f32.mrb[27].mxu1  ;;  %v2422_v63 = vpop.f32.mrb[29].mxu0 }
 0x1f5   : > { %2502 = vst [vmem:[%s4750_s24 + $0xc0] sm:$0xff] %v2470_v24  ;;  %v3564_v3 = vadd.f32 %v2410_v0, %v1565_v62 }
 0x1f6   : > { %v2473_v6 = vadd.f32 %v3563_v61, %v4743_v4 }
 0x1f7   : > { %v2472_v7 = vadd.f32 %v3564_v3, %v4745_v32  ;;  %v3383_v8 = vpop.f32.mrb[28].mxu1  ;;  %v3536_v9 = vpop.f32.mrb[30].mxu0 }
 0x1f8   : > { %2505 = vst [vmem:[%s4750_s24 + $0xd8] sm:$0xff] %v2473_v6  ;;  %v3565_v11 = vadd.f32 %v3533_v56, %v3383_v8  ;;  %v1579_v12 = vpop.f32.mrb[29].mxu1  ;;  %v2434_v17 = vpop.f32.mrb[31].mxu0 }
 0x1f9   : > { %2504 = vst [vmem:[%s4750_s24 + $0xd0] sm:$0xff] %v2472_v7  ;;  %v3566_v21 = vadd.f32 %v2422_v63, %v1579_v12 }
 0x1fa   : > { %v2475_v22 = vadd.f32 %v3565_v11, %v4743_v4 }
 0x1fb   : > { %v2474_v29 = vadd.f32 %v3566_v21, %v4745_v32  ;;  %v3386_v41 = vpop.f32.mrb[30].mxu1  ;;  %2516 = sbr.rel (!%p4088_p6) target bundleno = 570 (0x23a), region = 88 }
 0x1fc   : > { %2507 = vst [vmem:[%s4750_s24 + $0xe8] sm:$0xff] %v2475_v22  ;;  %v3567_v52 = vadd.f32 %v3536_v9, %v3386_v41  ;;  %v1593_v54 = vpop.f32.mrb[31].mxu1 }
 0x1fd   : > { %2506 = vst [vmem:[%s4750_s24 + $0xe0] sm:$0xff] %v2474_v29  ;;  %v3568_v55 = vadd.f32 %v2434_v17, %v1593_v54 }
 0x1fe   : > { %v2477_v1 = vadd.f32 %v3567_v52, %v4743_v4 }
 0x1ff   : > { %v2476_v10 = vadd.f32 %v3568_v55, %v4745_v32 }
 0x200   : > { %2509 = vst [vmem:[%s4750_s24 + $0xf8] sm:$0xff] %v2477_v1 }
 0x201   : > { %2508 = vst [vmem:[%s4750_s24 + $0xf0] sm:$0xff] %v2476_v10 }
 0x202   : > { %s5113_s25 = smov (!%p2520_p7, %s2519_s25), 2 }
 0x203   : > { %s3018_s7 = sshll.u32 %s5113_s25, 11 }
 0x204   : > { %p3021_p8 = scmp.eq.s32.totalorder %s3018_s7, 0 }
 0x205   : > { %s4827_s26 = sshrl.u32 (!%p3021_p8), %s5113_s25, 1 }
 0x206   : > { %2530 = sbr.rel (%p3021_p8) target bundleno = 570 (0x23a), region = 92  ;;  %p3022_p6 = scmp.le.s32.totalorder (!%p3021_p8), %s4827_s26, 0 }
 0x20d   : > { %2934 = sbr.rel (%p3022_p6) target bundleno = 549 (0x225), region = 206  ;;  %s5092_s14 = smov (!%p3022_p6), %s4821_s4 }
 0x20e   : > { %s5093_s21 = smov (!%p3022_p6), %s4750_s24  ;;  %s4836_s30 = smov (!%p3022_p6), 0  }
 0x20f   : > { %s4838_s5 = smov (!%p3022_p6), 0  }
 0x214 LB: >> { %v2684_v4 = vld [vmem:[%s4007_s21] sm:$0xff]  ;;  %v2686_v32 = vld [vmem:[%s4007_s21 + $0x8] sm:$0xff]  ;;  %v2688_v16 = vld [vmem:[%s4007_s21 + $0x10] sm:$0xff]  ;;  %s2748_s6 = sadd.s32 1, %s4011_s30  ;;  %s2678_s5 = sadd.s32 1, %s4015_s5   ;;  %s4015_s5 = sphi %s4838_s5, %s2678_s5   ;;  %s4011_s30 = sphi %s4836_s30, %s5096_s30   ;;  %s4007_s21 = sphi %s5093_s21, %s5095_s21   ;;  %s4003_s14 = sphi %s5092_s14, %s5094_s14  }
 0x215   : >> { %2685 = vst [vmem:[%s4003_s14] sm:$0xff] %v2684_v4  ;;  %2687 = vst [vmem:[%s4003_s14 + $0x8] sm:$0xff] %v2686_v32  ;;  %v2690_v18 = vld [vmem:[%s4007_s21 + $0x18] sm:$0xff]  ;;  %v2692_v44 = vld [vmem:[%s4007_s21 + $0x20] sm:$0xff]  ;;  %p2749_p9 = scmp.ge.s32.totalorder %s2748_s6, %s4827_s26  ;;  %p2677_p10 = scmp.ge.s32.totalorder %s2678_s5, %s4827_s26 }
 0x216   : >> { %2689 = vst [vmem:[%s4003_s14 + $0x18] sm:$0xff] %v2688_v16  ;;  %v2694_v51 = vld [vmem:[%s4007_s21 + $0x28] sm:$0xff]  ;;  %2691 = vst [vmem:[%s4003_s14 + $0x20] sm:$0xff] %v2690_v18  ;;  %v2696_v60 = vld [vmem:[%s4007_s21 + $0x30] sm:$0xff] }
 0x217   : >> { %2693 = vst [vmem:[%s4003_s14 + $0x30] sm:$0xff] %v2692_v44  ;;  %2695 = vst [vmem:[%s4003_s14 + $0x38] sm:$0xff] %v2694_v51  ;;  %v2698_v15 = vld [vmem:[%s4007_s21 + $0x38] sm:$0xff]  ;;  %v2700_v36 = vld [vmem:[%s4007_s21 + $0x40] sm:$0xff]  ;;  %s5115_s6 = smov (%p2749_p9, %s2748_s6), 0 }
 0x218   : >> { %2697 = vst [vmem:[%s4003_s14 + $0x48] sm:$0xff] %v2696_v60  ;;  %2699 = vst [vmem:[%s4003_s14 + $0x50] sm:$0xff] %v2698_v15  ;;  %v2702_v45 = vld [vmem:[%s4007_s21 + $0x48] sm:$0xff]  ;;  %v2704_v57 = vld [vmem:[%s4007_s21 + $0x50] sm:$0xff]  ;;  %s3023_s8 = sshll.u32 %s5115_s6, 4  ;;  %s5096_s30 = smov %s5115_s6 }
 0x219   : >> { %2701 = vst [vmem:[%s4003_s14 + $0x60] sm:$0xff] %v2700_v36  ;;  %v2706_v2 = vld [vmem:[%s4007_s21 + $0x58] sm:$0xff]  ;;  %2703 = vst [vmem:[%s4003_s14 + $0x68] sm:$0xff] %v2702_v45  ;;  %v2708_v26 = vld [vmem:[%s4007_s21 + $0x60] sm:$0xff]  ;;  %s4894_s9 = scalar_lea.vmem %s4750_s24, %s3023_s8 [#allocation3]   ;;  %s2754_s10 = scalar_lea.vmem %s4821_s4, %s3023_s8  }
 0x21a   : >> { %2705 = vst [vmem:[%s4003_s14 + $0x78] sm:$0xff] %v2704_v57  ;;  %2707 = vst [vmem:[%s4003_s14 + $0x80] sm:$0xff] %v2706_v2  ;;  %v2710_v19 = vld [vmem:[%s4007_s21 + $0x68] sm:$0xff]  ;;  %v2712_v20 = vld [vmem:[%s4007_s21 + $0x70] sm:$0xff] }
 0x21b   : >> { %2709 = vst [vmem:[%s4003_s14 + $0x90] sm:$0xff] %v2708_v26  ;;  %2711 = vst [vmem:[%s4003_s14 + $0x98] sm:$0xff] %v2710_v19  ;;  %v2714_v48 = vld [vmem:[%s4007_s21 + $0x78] sm:$0xff]  ;;  %v2716_v39 = vld [vmem:[%s4007_s21 + $0x80] sm:$0xff] }
 0x21c   : >> { %2713 = vst [vmem:[%s4003_s14 + $0xa8] sm:$0xff] %v2712_v20  ;;  %v2718_v13 = vld [vmem:[%s4007_s21 + $0x88] sm:$0xff]  ;;  %2715 = vst [vmem:[%s4003_s14 + $0xb0] sm:$0xff] %v2714_v48  ;;  %v2720_v46 = vld [vmem:[%s4007_s21 + $0x90] sm:$0xff] }
 0x21d   : >> { %2717 = vst [vmem:[%s4003_s14 + $0xc0] sm:$0xff] %v2716_v39  ;;  %2719 = vst [vmem:[%s4003_s14 + $0xc8] sm:$0xff] %v2718_v13  ;;  %v2722_v31 = vld [vmem:[%s4007_s21 + $0x98] sm:$0xff]  ;;  %v2724_v14 = vld [vmem:[%s4007_s21 + $0xa0] sm:$0xff] }
 0x21e   : >> { %2721 = vst [vmem:[%s4003_s14 + $0xd8] sm:$0xff] %v2720_v46  ;;  %2723 = vst [vmem:[%s4003_s14 + $0xe0] sm:$0xff] %v2722_v31  ;;  %v2726_v47 = vld [vmem:[%s4007_s21 + $0xa8] sm:$0xff]  ;;  %v2728_v38 = vld [vmem:[%s4007_s21 + $0xb0] sm:$0xff]  ;;  %2680 = sbr.rel (!%p2677_p10) target bundleno = 532 (0x214), region = 212 }
 0x21f   : >> { %2725 = vst [vmem:[%s4003_s14 + $0xf0] sm:$0xff] %v2724_v14  ;;  %v2730_v25 = vld [vmem:[%s4007_s21 + $0xb8] sm:$0xff]  ;;  %2727 = vst [vmem:[%s4003_s14 + $0xf8] sm:$0xff] %v2726_v47  ;;  %v2732_v34 = vld [vmem:[%s4007_s21 + $0xc0] sm:$0xff] }
 0x220   : >> { %2729 = vst [vmem:[%s4003_s14 + $0x108] sm:$0xff] %v2728_v38  ;;  %2731 = vst [vmem:[%s4003_s14 + $0x110] sm:$0xff] %v2730_v25  ;;  %v2734_v40 = vld [vmem:[%s4007_s21 + $0xc8] sm:$0xff]  ;;  %v2736_v58 = vld [vmem:[%s4007_s21 + $0xd0] sm:$0xff] }
 0x221   : >> { %2733 = vst [vmem:[%s4003_s14 + $0x120] sm:$0xff] %v2732_v34  ;;  %2735 = vst [vmem:[%s4003_s14 + $0x128] sm:$0xff] %v2734_v40  ;;  %v2738_v33 = vld [vmem:[%s4007_s21 + $0xd8] sm:$0xff]  ;;  %v2740_v28 = vld [vmem:[%s4007_s21 + $0xe0] sm:$0xff] }
 0x222   : >> { %2737 = vst [vmem:[%s4003_s14 + $0x138] sm:$0xff] %v2736_v58  ;;  %v2742_v23 = vld [vmem:[%s4007_s21 + $0xe8] sm:$0xff]  ;;  %2739 = vst [vmem:[%s4003_s14 + $0x140] sm:$0xff] %v2738_v33  ;;  %v2744_v49 = vld [vmem:[%s4007_s21 + $0xf0] sm:$0xff] }
 0x223   : >> { %2741 = vst [vmem:[%s4003_s14 + $0x150] sm:$0xff] %v2740_v28  ;;  %2743 = vst [vmem:[%s4003_s14 + $0x158] sm:$0xff] %v2742_v23  ;;  %v2746_v37 = vld [vmem:[%s4007_s21 + $0xf8] sm:$0xff]  ;;  %s5095_s21 = smov %s4894_s9 }
 0x224   : >> { %2745 = vst [vmem:[%s4003_s14 + $0x168] sm:$0xff] %v2744_v49  ;;  %2747 = vst [vmem:[%s4003_s14 + $0x170] sm:$0xff] %v2746_v37  ;;  %s5094_s14 = smov %s2754_s10 }
 0x225 PF: > { %s4935_s12 = sand.u32 1, %s5113_s25   ;;  %s3037_s11 = sshll.u32 %s4827_s26, 4 }
 0x226   : > { %s4939_s18 = scalar_lea.vmem %s4750_s24, %s3037_s11 [#allocation3]   ;;  %s4942_s19 = scalar_lea.vmem %s4821_s4, %s3037_s11  }
 0x227   : > { %p3028_p11 = scmp.le.s32.totalorder %s4935_s12, 0 }
 0x228   : > { %s5097_s20 = smov (!%p3028_p11), %s4942_s19  ;;  %s5098_s23 = smov (!%p3028_p11), %s4939_s18 }
 0x229   : > { %2948 = sbr.rel (%p3028_p11) target bundleno = 570 (0x23a), region = 217  ;;  %s4951_s27 = smov (!%p3028_p11), 0  }
 0x22a   : > { %s4953_s28 = smov (!%p3028_p11), 0  }
 0x230 LB: >> { %v2771_v5 = vld [vmem:[%s4023_s23] sm:$0xff]  ;;  %v2773_v27 = vld [vmem:[%s4023_s23 + $0x10] sm:$0xff]  ;;  %s2803_s24 = sadd.s32 1, %s4027_s27  ;;  %s2765_s28 = sadd.s32 1, %s4031_s28   ;;  %s4031_s28 = sphi %s4953_s28, %s2765_s28   ;;  %s4027_s27 = sphi %s4951_s27, %s5099_s27   ;;  %s4023_s23 = sphi %s5098_s23, %s2808_s23   ;;  %s4019_s20 = sphi %s5097_s20, %s2809_s20  }
 0x231   : >> { %v2775_v42 = vld [vmem:[%s4023_s23 + $0x20] sm:$0xff]  ;;  %2772 = vst [vmem:[%s4019_s20] sm:$0xff] %v2771_v5  ;;  %2774 = vst [vmem:[%s4019_s20 + $0x18] sm:$0xff] %v2773_v27  ;;  %v2777_v43 = vld [vmem:[%s4023_s23 + $0x30] sm:$0xff]  ;;  %p2804_p12 = scmp.ge.s32.totalorder %s2803_s24, %s4935_s12  ;;  %p2764_p13 = scmp.ge.s32.totalorder %s2765_s28, %s4935_s12 }
 0x232   : >> { %2776 = vst [vmem:[%s4019_s20 + $0x30] sm:$0xff] %v2775_v42  ;;  %v2779_v59 = vld [vmem:[%s4023_s23 + $0x40] sm:$0xff]  ;;  %v2781_v53 = vld [vmem:[%s4023_s23 + $0x50] sm:$0xff]  ;;  %2778 = vst [vmem:[%s4019_s20 + $0x48] sm:$0xff] %v2777_v43 }
 0x233   : >> { %2780 = vst [vmem:[%s4019_s20 + $0x60] sm:$0xff] %v2779_v59  ;;  %2782 = vst [vmem:[%s4019_s20 + $0x78] sm:$0xff] %v2781_v53  ;;  %v2783_v0 = vld [vmem:[%s4023_s23 + $0x60] sm:$0xff]  ;;  %v2785_v35 = vld [vmem:[%s4023_s23 + $0x70] sm:$0xff]  ;;  %s5117_s24 = smov (%p2804_p12, %s2803_s24), 0  ;;  %2767 = sbr.rel (!%p2764_p13) target bundleno = 560 (0x230), region = 223 }
 0x234   : >> { %v2787_v30 = vld [vmem:[%s4023_s23 + $0x80] sm:$0xff]  ;;  %2784 = vst [vmem:[%s4019_s20 + $0x90] sm:$0xff] %v2783_v0  ;;  %2786 = vst [vmem:[%s4019_s20 + $0xa8] sm:$0xff] %v2785_v35  ;;  %v2789_v24 = vld [vmem:[%s4023_s23 + $0x90] sm:$0xff]  ;;  %s3029_s25 = sshll.u32 %s5117_s24, 3  ;;  %s5099_s27 = smov %s5117_s24 }
 0x235   : >> { %2788 = vst [vmem:[%s4019_s20 + $0xc0] sm:$0xff] %v2787_v30  ;;  %v2791_v50 = vld [vmem:[%s4023_s23 + $0xa0] sm:$0xff]  ;;  %v2793_v56 = vld [vmem:[%s4023_s23 + $0xb0] sm:$0xff]  ;;  %2790 = vst [vmem:[%s4019_s20 + $0xd8] sm:$0xff] %v2789_v24 }
 0x236   : >> { %2792 = vst [vmem:[%s4019_s20 + $0xf0] sm:$0xff] %v2791_v50  ;;  %2794 = vst [vmem:[%s4019_s20 + $0x108] sm:$0xff] %v2793_v56  ;;  %v2795_v61 = vld [vmem:[%s4023_s23 + $0xc0] sm:$0xff]  ;;  %v2797_v62 = vld [vmem:[%s4023_s23 + $0xd0] sm:$0xff] }
 0x237   : >> { %v2799_v63 = vld [vmem:[%s4023_s23 + $0xe0] sm:$0xff]  ;;  %2796 = vst [vmem:[%s4019_s20 + $0x120] sm:$0xff] %v2795_v61  ;;  %2798 = vst [vmem:[%s4019_s20 + $0x138] sm:$0xff] %v2797_v62  ;;  %v2801_v3 = vld [vmem:[%s4023_s23 + $0xf0] sm:$0xff]  ;;  %s2808_s23 = scalar_lea.vmem %s4939_s18, %s3029_s25 [#allocation3]  }
 0x238   : >> { %2800 = vst [vmem:[%s4019_s20 + $0x150] sm:$0xff] %v2799_v63  ;;  %2802 = vst [vmem:[%s4019_s20 + $0x168] sm:$0xff] %v2801_v3  ;;  %s2809_s20 = scalar_lea.vmem %s4942_s19, %s3029_s25  }
 0x23a PF: > { %s13_s16 = sadd.s32 1, %s3967_s16   ;;  %s5100_s12 = smov %s3955_s13 }
 0x23b   : > { %p10_p0 = scmp.ge.s32.totalorder %s13_s16, 4   ;;  %s5101_s13 = smov %s4093_s22 }
 0x23c   : > { %s5102_s14 = smov %s3963_s15  ;;  %s5103_s15 = smov %s5105_s17 }
 0x23d   :  { %12 = sbr.rel (!%p10_p0) target bundleno = 3 (0x3), region = 234 }

</bundles_post_ra>
